<compile_context>
chip_gen: v7x
topology: tpu7x:2x2x1
jax: 0.10.0
libtpu: 0.0.40
codegen_flags: <defaults>
</compile_context>

<pallas_src>
import jax
import jax.numpy as jnp
import numpy as np
from jax.experimental import pallas as pl
from jax.experimental.pallas import tpu as pltpu

DICE_EPS = 1e-9   # nn.BatchNorm1d(..., eps=1e-09) inside Dice
BN_EPS = 1e-5     # default eps of the MLP input BatchNorm1d

EMB_DIM = 32
ATT_HIDDEN = (80, 40)
MLP_HIDDEN = (200, 80)

# lane-dense padded widths
H1_PAD = 128   # 80  -> 128
H2_PAD = 128   # 40  -> 128
M1_PAD = 256   # 200 -> 256
M2_PAD = 128   # 80  -> 128


# ------------------------------ fused kernel --------------------------------

def _din_fused_kernel(
        # batch-tiled data
        q_ref, f_ref, mask_ref, len_ref, ue_ref,
        # attention params (stacked / padded / folded)
        a_w1_ref, a_wq_ref, a_b1_ref, a_s1_ref, a_t1_ref,
        a_w2_ref, a_b2_ref, a_s2_ref, a_t2_ref, a_w3_ref, a_b3_ref,
        # output-MLP params (input BN folded into the first, stacked layer)
        m_w1_ref, m_b1_ref, m_s1_ref, m_t1_ref,
        m_w2_ref, m_b2_ref, m_s2_ref, m_t2_ref, m_w3_ref, m_b3_ref,
        # output
        out_ref):
    TB, T, D = f_ref.shape
    H1P = a_w1_ref.shape[1]
    H2P = a_w2_ref.shape[1]

    f_bf = f_ref[...]                                  # (TB, T, D) bf16
    f_f32 = f_bf.astype(jnp.float32)                   # f32 copy for VPU math / reductions
    q_f32 = q_ref[...]                                 # (TB, D) f32
    q_bf = q_f32.astype(jnp.bfloat16)

    # ---- attention layer 1: single lane-dense K=2D matmul on [f | f*q] ----
    fq_f32 = f_f32 * q_f32[:, None, :]                 # elementwise in f32 (v5e-friendly)
    comb = jnp.concatenate([f_f32, fq_f32], axis=-1)   # (TB, T, 2D)
    comb_bf = comb.astype(jnp.bfloat16).reshape(TB * T, 2 * D)

    # query-only contribution, computed once per batch row and broadcast over T
    qc = (jnp.dot(q_bf, a_wq_ref[...], preferred_element_type=jnp.float32)
          + a_b1_ref[...])                             # (TB, H1P)

    h1 = jnp.dot(comb_bf, a_w1_ref[...], preferred_element_type=jnp.float32)
    h1 = h1.reshape(TB, T, H1P) + qc[:, None, :]       # implicit broadcast, no temp
    h1 = jax.nn.sigmoid(h1 * a_s1_ref[...] + a_t1_ref[...]) * h1   # Dice (eval BN)

    h2 = (jnp.dot(h1.reshape(TB * T, H1P).astype(jnp.bfloat16), a_w2_ref[...],
                  preferred_element_type=jnp.float32) + a_b2_ref[...])
    h2 = jax.nn.sigmoid(h2 * a_s2_ref[...] + a_t2_ref[...]) * h2   # (TB*T, H2P)

    # final linear(H2 -> 1) + sigmoid: VPU multiply + lane reduce
    logits = (jnp.sum(h2.reshape(TB, T, H2P) * a_w3_ref[...][None, :, :], axis=-1)
              + a_b3_ref[...])                         # (TB, T)
    scores = jax.nn.sigmoid(logits)

    mask = mask_ref[...]                               # (TB, T) f32
    scores = jnp.where(mask == 1.0, scores, jnp.float32(-2.0 ** 31))
    scores = scores - jnp.max(scores, axis=-1, keepdims=True)
    e = jnp.exp(scores)
    p = e * pl.reciprocal(jnp.sum(e, axis=-1, keepdims=True), approx=True) * mask

    # attention feature and mask-averaged history: broadcast-mul + sublane reduce (f32)
    att = jnp.sum(p[:, :, None] * f_f32, axis=1)                         # (TB, D)
    hist = (jnp.sum(mask[:, :, None] * f_f32, axis=1)
            * pl.reciprocal(len_ref[...], approx=True))                  # (TB, D)

    # ---- output MLP: single K=E+3D matmul on [ue | item | hist | att], bf16 MXU ----
    x = jnp.concatenate([ue_ref[...], q_f32, hist, att], axis=-1)        # (TB, E+3D)
    h = (jnp.dot(x.astype(jnp.bfloat16), m_w1_ref[...],
                 preferred_element_type=jnp.float32) + m_b1_ref[...])    # (TB, M1P)
    h = jax.nn.sigmoid(h * m_s1_ref[...] + m_t1_ref[...]) * h
    h = (jnp.dot(h.astype(jnp.bfloat16), m_w2_ref[...],
                 preferred_element_type=jnp.float32) + m_b2_ref[...])
    h = jax.nn.sigmoid(h * m_s2_ref[...] + m_t2_ref[...]) * h            # (TB, M2P)

    out_ref[...] = (jnp.sum(h * m_w3_ref[...], axis=-1, keepdims=True)
                    + m_b3_ref[...])                                     # (TB, 1)


# ------------------------- parameter preparation -----------------------------

def _pad_last(x, n):
    return jnp.pad(x, [(0, 0)] * (x.ndim - 1) + [(0, n - x.shape[-1])])


def _pad_rows(x, n):
    return jnp.pad(x, [(0, n - x.shape[0]), (0, 0)])


def _dice_scale_shift(g, be, m, v, eps):
    s = g * jax.lax.rsqrt(v + eps)
    return s, be - m * s


def prepare_params(p, emb_dim):
    """Fold eval-mode BN into scale/shift, stack/fold weights, pad lanes, cast to bf16."""
    E = emb_dim
    D = 2 * emb_dim
    kp = {}

    # ---- attention layer 1: fold 4-way concat [f, q, f*q, q-f] into 2 stacked weights ----
    w1 = p['att_w1']                                                   # (4D, 80)
    w_f = w1[0:D] - w1[3 * D:4 * D]                                    # multiplies f
    w_fq = w1[2 * D:3 * D]                                             # multiplies f*q
    w_q = w1[D:2 * D] + w1[3 * D:4 * D]                                # multiplies q only
    kp['a_w1'] = _pad_last(jnp.concatenate([w_f, w_fq], axis=0), H1_PAD).astype(jnp.bfloat16)
    kp['a_wq'] = _pad_last(w_q, H1_PAD).astype(jnp.bfloat16)
    kp['a_b1'] = _pad_last(p['att_b1'], H1_PAD)
    s, t = _dice_scale_shift(p['att_g1'], p['att_be1'], p['att_m1'], p['att_v1'], DICE_EPS)
    kp['a_s1'], kp['a_t1'] = _pad_last(s, H1_PAD), _pad_last(t, H1_PAD)

    kp['a_w2'] = _pad_last(_pad_rows(p['att_w2'], H1_PAD), H2_PAD).astype(jnp.bfloat16)
    kp['a_b2'] = _pad_last(p['att_b2'], H2_PAD)
    s, t = _dice_scale_shift(p['att_g2'], p['att_be2'], p['att_m2'], p['att_v2'], DICE_EPS)
    kp['a_s2'], kp['a_t2'] = _pad_last(s, H2_PAD), _pad_last(t, H2_PAD)

    kp['a_w3'] = _pad_last(p['att_w3'], H2_PAD)                        # (1, H2_PAD) f32
    kp['a_b3'] = p['att_b3']                                           # (1, 1)

    # ---- output MLP: fold eval-mode input BN into the first linear, keep stacked ----
    s0 = p['mlp_g0'] * jax.lax.rsqrt(p['mlp_v0'] + BN_EPS)             # (1, 7E)
    t0 = p['mlp_be0'] - p['mlp_m0'] * s0
    w1m = p['mlp_w1'] * s0.reshape(-1, 1)                              # (7E, 200)
    b1m = p['mlp_b1'] + t0 @ p['mlp_w1']                               # (1, 200)
    kp['m_w1'] = _pad_last(w1m, M1_PAD).astype(jnp.bfloat16)           # (7E, M1_PAD) bf16
    kp['m_b1'] = _pad_last(b1m, M1_PAD)
    s, t = _dice_scale_shift(p['mlp_g1'], p['mlp_be1'], p['mlp_m1'], p['mlp_v1'], DICE_EPS)
    kp['m_s1'], kp['m_t1'] = _pad_last(s, M1_PAD), _pad_last(t, M1_PAD)

    kp['m_w2'] = _pad_last(_pad_rows(p['mlp_w2'], M1_PAD), M2_PAD).astype(jnp.bfloat16)
    kp['m_b2'] = _pad_last(p['mlp_b2'], M2_PAD)
    s, t = _dice_scale_shift(p['mlp_g2'], p['mlp_be2'], p['mlp_m2'], p['mlp_v2'], DICE_EPS)
    kp['m_s2'], kp['m_t2'] = _pad_last(s, M2_PAD), _pad_last(t, M2_PAD)

    kp['m_w3'] = _pad_rows(p['mlp_w3'], M2_PAD).T                      # (1, M2_PAD) f32
    kp['m_b3'] = p['mlp_b3']                                           # (1, 1)
    return kp


# -------------------------------- wrapper ------------------------------------

_WEIGHT_ORDER = ('a_w1', 'a_wq', 'a_b1', 'a_s1', 'a_t1',
                 'a_w2', 'a_b2', 'a_s2', 'a_t2', 'a_w3', 'a_b3',
                 'm_w1', 'm_b1', 'm_s1', 'm_t1',
                 'm_w2', 'm_b2', 'm_s2', 'm_t2', 'm_w3', 'm_b3')


def _full_spec(arr):
    """Whole-array block with a constant index map -> stays VMEM-resident over the grid."""
    zeros = (0,) * arr.ndim
    return pl.BlockSpec(arr.shape, lambda b, _z=zeros: _z)


def din_pallas(kp, ue, item, item_hist, mask, seq_len_f, *, target_rows=1024, max_tb=256):
    """Fused DIN forward: attention + masked softmax + history sums + output MLP."""
    B, T, D = item_hist.shape
    E = ue.shape[1]

    # adaptive batch tile: aim for ~target_rows (B*T) rows per grid step, TB multiple of 8
    tb = max(8, min(max_tb, ((target_rows // max(T, 1)) // 8) * 8))
    if B <= tb:
        TB, Bp = B, B
    else:
        TB = tb
        Bp = ((B + TB - 1) // TB) * TB
    if Bp != B:
        pad = Bp - B
        ue = jnp.pad(ue, ((0, pad), (0, 0)))
        item = jnp.pad(item, ((0, pad), (0, 0)))
        item_hist = jnp.pad(item_hist, ((0, pad), (0, 0), (0, 0)))
        mask = jnp.pad(mask, ((0, pad), (0, 0)))
        seq_len_f = jnp.pad(seq_len_f, ((0, pad), (0, 0)), constant_values=1.0)

    fact_bf = item_hist.astype(jnp.bfloat16)      # halve HBM/VMEM traffic of the big stream

    weights = [kp[name] for name in _WEIGHT_ORDER]

    data_specs = [
        pl.BlockSpec((TB, D), lambda b: (b, 0)),        # query (item embedding), f32
        pl.BlockSpec((TB, T, D), lambda b: (b, 0, 0)),  # fact (item history), bf16
        pl.BlockSpec((TB, T), lambda b: (b, 0)),        # mask, f32
        pl.BlockSpec((TB, 1), lambda b: (b, 0)),        # sequence length, f32
        pl.BlockSpec((TB, E), lambda b: (b, 0)),        # user embedding, f32
    ]
    weight_specs = [_full_spec(w) for w in weights]

    out = pl.pallas_call(
        _din_fused_kernel,
        grid=(Bp // TB,),
        in_specs=data_specs + weight_specs,
        out_specs=pl.BlockSpec((TB, 1), lambda b: (b, 0)),
        out_shape=jax.ShapeDtypeStruct((Bp, 1), jnp.float32),
        compiler_params=pltpu.CompilerParams(
            dimension_semantics=("parallel",),
            vmem_limit_bytes=32 * 1024 * 1024),
    )(item, fact_bf, mask, seq_len_f, ue, *weights)

    return out[:B, 0]


# ------------------------------ parameters ----------------------------------

def init_params(key, n_uid, n_mid, n_cid, emb_dim):
    keys = iter(jax.random.split(key, 32))

    def linear(fan_in, fan_out):
        bound = 1.0 / np.sqrt(fan_in)
        w = jax.random.uniform(next(keys), (fan_in, fan_out), jnp.float32, -bound, bound)
        b = jax.random.uniform(next(keys), (1, fan_out), jnp.float32, -bound, bound)
        return w, b

    def bn(n):  # (gamma, beta, running_mean, running_var) — PyTorch default init
        return (jnp.ones((1, n), jnp.float32), jnp.zeros((1, n), jnp.float32),
                jnp.zeros((1, n), jnp.float32), jnp.ones((1, n), jnp.float32))

    p = {}
    p['emb_user'] = jax.random.normal(next(keys), (n_uid, emb_dim), jnp.float32)
    p['emb_mat'] = jax.random.normal(next(keys), (n_mid, emb_dim), jnp.float32)
    p['emb_cat'] = jax.random.normal(next(keys), (n_cid, emb_dim), jnp.float32)

    D = 2 * emb_dim                    # item embedding width
    h1, h2 = ATT_HIDDEN
    p['att_w1'], p['att_b1'] = linear(4 * D, h1)       # embedding_dim * 8 == 4 * 2E
    p['att_g1'], p['att_be1'], p['att_m1'], p['att_v1'] = bn(h1)
    p['att_w2'], p['att_b2'] = linear(h1, h2)
    p['att_g2'], p['att_be2'], p['att_m2'], p['att_v2'] = bn(h2)
    w3, b3 = linear(h2, 1)
    p['att_w3'] = w3.T                                 # stored as (1, h2) row
    p['att_b3'] = b3                                   # (1, 1)

    f = 7 * emb_dim
    m1, m2 = MLP_HIDDEN
    p['mlp_g0'], p['mlp_be0'], p['mlp_m0'], p['mlp_v0'] = bn(f)
    p['mlp_w1'], p['mlp_b1'] = linear(f, m1)
    p['mlp_g1'], p['mlp_be1'], p['mlp_m1'], p['mlp_v1'] = bn(m1)
    p['mlp_w2'], p['mlp_b2'] = linear(m1, m2)
    p['mlp_g2'], p['mlp_be2'], p['mlp_m2'], p['mlp_v2'] = bn(m2)
    p['mlp_w3'], p['mlp_b3'] = linear(m2, 1)
    return p


# ------------------------------ DIN forward ---------------------------------

def din_forward(params, data):
    user, mat_hist, cat_hist, mask, seq_len, material, category = data
    # embedding gathers (glue, plain JAX)
    ue = params['emb_user'][user]                      # (B, E)
    me = params['emb_mat'][material]                   # (B, E)
    ce = params['emb_cat'][category]                   # (B, E)
    mhe = params['emb_mat'][mat_hist]                  # (B, T, E)
    che = params['emb_cat'][cat_hist]                  # (B, T, E)

    item = jnp.concatenate([me, ce], axis=1)           # (B, 2E)
    item_hist = jnp.concatenate([mhe, che], axis=2)    # (B, T, 2E)
    seq_len_f = seq_len.astype(jnp.float32)[:, None]   # (B, 1)

    kp = prepare_params(params, EMB_DIM)
    return din_pallas(kp, ue, item, item_hist, mask, seq_len_f)


# ----------------------- pure-JAX reference (check) --------------------------

def din_reference(params, data):
    user, mat_hist, cat_hist, mask, seq_len, material, category = data
    ue = params['emb_user'][user]
    me = params['emb_mat'][material]
    ce = params['emb_cat'][category]
    mhe = params['emb_mat'][mat_hist]
    che = params['emb_cat'][cat_hist]
    item = jnp.concatenate([me, ce], axis=1)
    item_hist = jnp.concatenate([mhe, che], axis=2)
    B, T, D = item_hist.shape
    seq_len_f = seq_len.astype(jnp.float32)[:, None]

    hist_sum = jnp.einsum('bt,btd->bd', mask, item_hist) / seq_len_f

    def dice(h, g, be, m, v):
        return jax.nn.sigmoid((h - m) / jnp.sqrt(v + DICE_EPS) * g + be) * h

    qb = jnp.broadcast_to(item[:, None, :], (B, T, D))
    comb = jnp.concatenate([item_hist, qb, item_hist * qb, qb - item_hist], axis=2)
    h = jnp.dot(comb, params['att_w1']) + params['att_b1']
    h = dice(h, params['att_g1'], params['att_be1'], params['att_m1'], params['att_v1'])
    h = jnp.dot(h, params['att_w2']) + params['att_b2']
    h = dice(h, params['att_g2'], params['att_be2'], params['att_m2'], params['att_v2'])
    logits = jnp.sum(h * params['att_w3'], axis=-1) + params['att_b3']
    s = jax.nn.sigmoid(logits)
    s = jnp.where(mask == 1.0, s, -2.0 ** 31)
    s = jax.nn.softmax(s, axis=-1) * mask
    att = jnp.einsum('bt,btd->bd', s, item_hist)

    x = jnp.concatenate([ue, item, hist_sum, att], axis=1)
    x = (x - params['mlp_m0']) / jnp.sqrt(params['mlp_v0'] + BN_EPS) * params['mlp_g0'] + params['mlp_be0']
    x = jnp.dot(x, params['mlp_w1']) + params['mlp_b1']
    x = dice(x, params['mlp_g1'], params['mlp_be1'], params['mlp_m1'], params['mlp_v1'])
    x = jnp.dot(x, params['mlp_w2']) + params['mlp_b2']
    x = dice(x, params['mlp_g2'], params['mlp_be2'], params['mlp_m2'], params['mlp_v2'])
    x = jnp.dot(x, params['mlp_w3']) + params['mlp_b3']
    return jnp.squeeze(x)


# ---------------------------------- main -------------------------------------

if __name__ == "__main__":
    key = jax.random.PRNGKey(0)
    n_uid, n_mid, n_cid = 10, 20, 6
    B, T = 2, 8

    kp_, kd = jax.random.split(key)
    params = init_params(kp_, n_uid, n_mid, n_cid, EMB_DIM)

    ks = jax.random.split(kd, 6)
    user = jax.random.randint(ks[0], (B,), 0, n_uid)
    material = jax.random.randint(ks[1], (B,), 0, n_mid)
    category = jax.random.randint(ks[2], (B,), 0, n_cid)
    mat_hist = jax.random.randint(ks[3], (B, T), 0, n_mid)
    cat_hist = jax.random.randint(ks[4], (B, T), 0, n_cid)
    seq_len = jnp.array([T, 5], dtype=jnp.int32)
    mask = (jnp.arange(T)[None, :] < seq_len[:, None]).astype(jnp.float32)

    data = (user, mat_hist, cat_hist, mask, seq_len, material, category)

    out = jax.block_until_ready(din_forward(params, data))
    ref = jax.block_until_ready(din_reference(params, data))

    assert out.shape == (B,), f"bad output shape {out.shape}"
    if not np.allclose(np.asarray(out), np.asarray(ref), rtol=2e-2, atol=2e-2):
        raise AssertionError(f"Pallas/Reference mismatch: {out} vs {ref}")
    print("KERNEL_OK")
</pallas_src>

<mosaic_0001>
module attributes {stable_mosaic.version = 11 : i64} {
  func.func @_din_fused_kernel(%arg0: i32, %arg1: memref<2x64xf32, #tpu.memory_space<vmem>>, %arg2: memref<2x8x64xbf16, #tpu.memory_space<vmem>>, %arg3: memref<2x8xf32, #tpu.memory_space<vmem>>, %arg4: memref<2x1xf32, #tpu.memory_space<vmem>>, %arg5: memref<2x32xf32, #tpu.memory_space<vmem>>, %arg6: memref<128x128xbf16, #tpu.memory_space<vmem>>, %arg7: memref<64x128xbf16, #tpu.memory_space<vmem>>, %arg8: memref<1x128xf32, #tpu.memory_space<vmem>>, %arg9: memref<1x128xf32, #tpu.memory_space<vmem>>, %arg10: memref<1x128xf32, #tpu.memory_space<vmem>>, %arg11: memref<128x128xbf16, #tpu.memory_space<vmem>>, %arg12: memref<1x128xf32, #tpu.memory_space<vmem>>, %arg13: memref<1x128xf32, #tpu.memory_space<vmem>>, %arg14: memref<1x128xf32, #tpu.memory_space<vmem>>, %arg15: memref<1x128xf32, #tpu.memory_space<vmem>>, %arg16: memref<1x1xf32, #tpu.memory_space<vmem>>, %arg17: memref<224x256xbf16, #tpu.memory_space<vmem>>, %arg18: memref<1x256xf32, #tpu.memory_space<vmem>>, %arg19: memref<1x256xf32, #tpu.memory_space<vmem>>, %arg20: memref<1x256xf32, #tpu.memory_space<vmem>>, %arg21: memref<256x128xbf16, #tpu.memory_space<vmem>>, %arg22: memref<1x128xf32, #tpu.memory_space<vmem>>, %arg23: memref<1x128xf32, #tpu.memory_space<vmem>>, %arg24: memref<1x128xf32, #tpu.memory_space<vmem>>, %arg25: memref<1x128xf32, #tpu.memory_space<vmem>>, %arg26: memref<1x1xf32, #tpu.memory_space<vmem>>, %arg27: memref<2x1xf32, #tpu.memory_space<vmem>>) attributes {dimension_semantics = [#tpu.dimension_semantics<parallel>], iteration_bounds = array<i64: 1>, scalar_prefetch = 0 : i64, scratch_operands = 0 : i64, tpu.core_type = #tpu.core_type<tc>, window_params = [{transform_indices = @transform_0, window_bounds = array<i64: 2, 64>}, {transform_indices = @transform_1, window_bounds = array<i64: 2, 8, 64>}, {transform_indices = @transform_2, window_bounds = array<i64: 2, 8>}, {transform_indices = @transform_3, window_bounds = array<i64: 2, 1>}, {transform_indices = @transform_4, window_bounds = array<i64: 2, 32>}, {pipeline_mode = #tpu.pipeline_mode<synchronous>, transform_indices = @transform_5, window_bounds = array<i64: 128, 128>}, {pipeline_mode = #tpu.pipeline_mode<synchronous>, transform_indices = @transform_6, window_bounds = array<i64: 64, 128>}, {pipeline_mode = #tpu.pipeline_mode<synchronous>, transform_indices = @transform_7, window_bounds = array<i64: 1, 128>}, {pipeline_mode = #tpu.pipeline_mode<synchronous>, transform_indices = @transform_8, window_bounds = array<i64: 1, 128>}, {pipeline_mode = #tpu.pipeline_mode<synchronous>, transform_indices = @transform_9, window_bounds = array<i64: 1, 128>}, {pipeline_mode = #tpu.pipeline_mode<synchronous>, transform_indices = @transform_10, window_bounds = array<i64: 128, 128>}, {pipeline_mode = #tpu.pipeline_mode<synchronous>, transform_indices = @transform_11, window_bounds = array<i64: 1, 128>}, {pipeline_mode = #tpu.pipeline_mode<synchronous>, transform_indices = @transform_12, window_bounds = array<i64: 1, 128>}, {pipeline_mode = #tpu.pipeline_mode<synchronous>, transform_indices = @transform_13, window_bounds = array<i64: 1, 128>}, {pipeline_mode = #tpu.pipeline_mode<synchronous>, transform_indices = @transform_14, window_bounds = array<i64: 1, 128>}, {pipeline_mode = #tpu.pipeline_mode<synchronous>, transform_indices = @transform_15, window_bounds = array<i64: 1, 1>}, {pipeline_mode = #tpu.pipeline_mode<synchronous>, transform_indices = @transform_16, window_bounds = array<i64: 224, 256>}, {pipeline_mode = #tpu.pipeline_mode<synchronous>, transform_indices = @transform_17, window_bounds = array<i64: 1, 256>}, {pipeline_mode = #tpu.pipeline_mode<synchronous>, transform_indices = @transform_18, window_bounds = array<i64: 1, 256>}, {pipeline_mode = #tpu.pipeline_mode<synchronous>, transform_indices = @transform_19, window_bounds = array<i64: 1, 256>}, {pipeline_mode = #tpu.pipeline_mode<synchronous>, transform_indices = @transform_20, window_bounds = array<i64: 256, 128>}, {pipeline_mode = #tpu.pipeline_mode<synchronous>, transform_indices = @transform_21, window_bounds = array<i64: 1, 128>}, {pipeline_mode = #tpu.pipeline_mode<synchronous>, transform_indices = @transform_22, window_bounds = array<i64: 1, 128>}, {pipeline_mode = #tpu.pipeline_mode<synchronous>, transform_indices = @transform_23, window_bounds = array<i64: 1, 128>}, {pipeline_mode = #tpu.pipeline_mode<synchronous>, transform_indices = @transform_24, window_bounds = array<i64: 1, 128>}, {pipeline_mode = #tpu.pipeline_mode<synchronous>, transform_indices = @transform_25, window_bounds = array<i64: 1, 1>}, {transform_indices = @transform_26, window_bounds = array<i64: 2, 1>}]} {
    %c0 = arith.constant 0 : index
    %c0_0 = arith.constant 0 : index
    %c0_1 = arith.constant 0 : index
    %0 = vector.load %arg2[%c0, %c0_0, %c0_1] : memref<2x8x64xbf16, #tpu.memory_space<vmem>>, vector<2x8x64xbf16>
    %1 = arith.extf %0 : vector<2x8x64xbf16> to vector<2x8x64xf32>
    %c0_2 = arith.constant 0 : index
    %c0_3 = arith.constant 0 : index
    %2 = vector.load %arg1[%c0_2, %c0_3] : memref<2x64xf32, #tpu.memory_space<vmem>>, vector<2x64xf32>
    %3 = arith.truncf %2 : vector<2x64xf32> to vector<2x64xbf16>
    %4 = vector.shape_cast %2 : vector<2x64xf32> to vector<2x1x64xf32>
    %5 = vector.broadcast %4 : vector<2x1x64xf32> to vector<2x8x64xf32>
    %6 = arith.mulf %1, %5 : vector<2x8x64xf32>
    %7 = tpu.concatenate %1, %6 in 2 : vector<2x8x64xf32>, vector<2x8x64xf32> -> vector<2x8x128xf32>
    %8 = arith.truncf %7 : vector<2x8x128xf32> to vector<2x8x128xbf16>
    %9 = vector.shape_cast %8 : vector<2x8x128xbf16> to vector<16x128xbf16>
    %c0_4 = arith.constant 0 : index
    %c0_5 = arith.constant 0 : index
    %10 = vector.load %arg7[%c0_4, %c0_5] : memref<64x128xbf16, #tpu.memory_space<vmem>>, vector<64x128xbf16>
    %cst = arith.constant dense<0.000000e+00> : vector<2x128xf32>
    %11 = tpu.matmul %3, %10, %cst {dimension_numbers = #tpu.dot_dimension_numbers<[1], [0], [0], [1], [0, 0, 1, 1], [], []>} : vector<2x64xbf16>, vector<64x128xbf16>, vector<2x128xf32> -> vector<2x128xf32>
    %c0_6 = arith.constant 0 : index
    %c0_7 = arith.constant 0 : index
    %12 = vector.load %arg8[%c0_6, %c0_7] : memref<1x128xf32, #tpu.memory_space<vmem>>, vector<1x128xf32>
    %13 = vector.broadcast %12 : vector<1x128xf32> to vector<2x128xf32>
    %14 = arith.addf %11, %13 : vector<2x128xf32>
    %c0_8 = arith.constant 0 : index
    %c0_9 = arith.constant 0 : index
    %15 = vector.load %arg6[%c0_8, %c0_9] : memref<128x128xbf16, #tpu.memory_space<vmem>>, vector<128x128xbf16>
    %cst_10 = arith.constant dense<0.000000e+00> : vector<16x128xf32>
    %16 = tpu.matmul %9, %15, %cst_10 {dimension_numbers = #tpu.dot_dimension_numbers<[1], [0], [0], [1], [0, 0, 1, 1], [], []>} : vector<16x128xbf16>, vector<128x128xbf16>, vector<16x128xf32> -> vector<16x128xf32>
    %17 = vector.shape_cast %16 : vector<16x128xf32> to vector<2x8x128xf32>
    %18 = vector.shape_cast %14 : vector<2x128xf32> to vector<2x1x128xf32>
    %19 = vector.broadcast %18 : vector<2x1x128xf32> to vector<2x8x128xf32>
    %20 = arith.addf %17, %19 : vector<2x8x128xf32>
    %c0_11 = arith.constant 0 : index
    %c0_12 = arith.constant 0 : index
    %21 = vector.load %arg9[%c0_11, %c0_12] : memref<1x128xf32, #tpu.memory_space<vmem>>, vector<1x128xf32>
    %22 = vector.shape_cast %21 : vector<1x128xf32> to vector<1x1x128xf32>
    %23 = vector.broadcast %22 : vector<1x1x128xf32> to vector<2x8x128xf32>
    %24 = arith.mulf %20, %23 : vector<2x8x128xf32>
    %c0_13 = arith.constant 0 : index
    %c0_14 = arith.constant 0 : index
    %25 = vector.load %arg10[%c0_13, %c0_14] : memref<1x128xf32, #tpu.memory_space<vmem>>, vector<1x128xf32>
    %26 = vector.shape_cast %25 : vector<1x128xf32> to vector<1x1x128xf32>
    %27 = vector.broadcast %26 : vector<1x1x128xf32> to vector<2x8x128xf32>
    %28 = arith.addf %24, %27 : vector<2x8x128xf32>
    %29 = arith.negf %28 : vector<2x8x128xf32>
    %30 = math.exp %29 : vector<2x8x128xf32>
    %cst_15 = arith.constant 1.000000e+00 : f32
    %31 = vector.broadcast %cst_15 : f32 to vector<2x8x128xf32>
    %32 = arith.addf %31, %30 : vector<2x8x128xf32>
    %33 = arith.divf %31, %32 : vector<2x8x128xf32>
    %34 = arith.mulf %33, %20 : vector<2x8x128xf32>
    %35 = vector.shape_cast %34 : vector<2x8x128xf32> to vector<16x128xf32>
    %36 = arith.truncf %35 : vector<16x128xf32> to vector<16x128xbf16>
    %c0_16 = arith.constant 0 : index
    %c0_17 = arith.constant 0 : index
    %37 = vector.load %arg11[%c0_16, %c0_17] : memref<128x128xbf16, #tpu.memory_space<vmem>>, vector<128x128xbf16>
    %cst_18 = arith.constant dense<0.000000e+00> : vector<16x128xf32>
    %38 = tpu.matmul %36, %37, %cst_18 {dimension_numbers = #tpu.dot_dimension_numbers<[1], [0], [0], [1], [0, 0, 1, 1], [], []>} : vector<16x128xbf16>, vector<128x128xbf16>, vector<16x128xf32> -> vector<16x128xf32>
    %c0_19 = arith.constant 0 : index
    %c0_20 = arith.constant 0 : index
    %39 = vector.load %arg12[%c0_19, %c0_20] : memref<1x128xf32, #tpu.memory_space<vmem>>, vector<1x128xf32>
    %40 = vector.broadcast %39 : vector<1x128xf32> to vector<16x128xf32>
    %41 = arith.addf %38, %40 : vector<16x128xf32>
    %c0_21 = arith.constant 0 : index
    %c0_22 = arith.constant 0 : index
    %42 = vector.load %arg13[%c0_21, %c0_22] : memref<1x128xf32, #tpu.memory_space<vmem>>, vector<1x128xf32>
    %43 = vector.broadcast %42 : vector<1x128xf32> to vector<16x128xf32>
    %44 = arith.mulf %41, %43 : vector<16x128xf32>
    %c0_23 = arith.constant 0 : index
    %c0_24 = arith.constant 0 : index
    %45 = vector.load %arg14[%c0_23, %c0_24] : memref<1x128xf32, #tpu.memory_space<vmem>>, vector<1x128xf32>
    %46 = vector.broadcast %45 : vector<1x128xf32> to vector<16x128xf32>
    %47 = arith.addf %44, %46 : vector<16x128xf32>
    %48 = arith.negf %47 : vector<16x128xf32>
    %49 = math.exp %48 : vector<16x128xf32>
    %cst_25 = arith.constant 1.000000e+00 : f32
    %50 = vector.broadcast %cst_25 : f32 to vector<16x128xf32>
    %51 = arith.addf %50, %49 : vector<16x128xf32>
    %52 = arith.divf %50, %51 : vector<16x128xf32>
    %53 = arith.mulf %52, %41 : vector<16x128xf32>
    %54 = vector.shape_cast %53 : vector<16x128xf32> to vector<2x8x128xf32>
    %c0_26 = arith.constant 0 : index
    %c0_27 = arith.constant 0 : index
    %55 = vector.load %arg15[%c0_26, %c0_27] : memref<1x128xf32, #tpu.memory_space<vmem>>, vector<1x128xf32>
    %56 = vector.shape_cast %55 : vector<1x128xf32> to vector<1x1x128xf32>
    %57 = vector.broadcast %56 : vector<1x1x128xf32> to vector<2x8x128xf32>
    %58 = arith.mulf %54, %57 : vector<2x8x128xf32>
    %cst_28 = arith.constant dense<0.000000e+00> : vector<2x8xf32>
    %59 = vector.multi_reduction <add>, %58, %cst_28 [2] : vector<2x8x128xf32> to vector<2x8xf32>
    %c0_29 = arith.constant 0 : index
    %c0_30 = arith.constant 0 : index
    %60 = vector.load %arg16[%c0_29, %c0_30] : memref<1x1xf32, #tpu.memory_space<vmem>>, vector<1x1xf32>
    %61 = vector.broadcast %60 : vector<1x1xf32> to vector<2x8xf32>
    %62 = arith.addf %59, %61 : vector<2x8xf32>
    %63 = arith.negf %62 : vector<2x8xf32>
    %64 = math.exp %63 : vector<2x8xf32>
    %cst_31 = arith.constant 1.000000e+00 : f32
    %65 = vector.broadcast %cst_31 : f32 to vector<2x8xf32>
    %66 = arith.addf %65, %64 : vector<2x8xf32>
    %67 = arith.divf %65, %66 : vector<2x8xf32>
    %c0_32 = arith.constant 0 : index
    %c0_33 = arith.constant 0 : index
    %68 = vector.load %arg3[%c0_32, %c0_33] : memref<2x8xf32, #tpu.memory_space<vmem>>, vector<2x8xf32>
    %cst_34 = arith.constant 1.000000e+00 : f32
    %69 = vector.broadcast %cst_34 : f32 to vector<2x8xf32>
    %70 = arith.cmpf oeq, %68, %69 : vector<2x8xf32>
    %cst_35 = arith.constant -2.14748365E+9 : f32
    %71 = vector.broadcast %cst_35 : f32 to vector<2x8xf32>
    %72 = arith.select %70, %67, %71 : vector<2x8xi1>, vector<2x8xf32>
    %cst_36 = arith.constant dense<0xFF800000> : vector<2xf32>
    %73 = vector.multi_reduction <maximumf>, %72, %cst_36 [1] : vector<2x8xf32> to vector<2xf32>
    %74 = vector.shape_cast %73 : vector<2xf32> to vector<2x1xf32>
    %75 = vector.broadcast %74 : vector<2x1xf32> to vector<2x8xf32>
    %76 = arith.subf %72, %75 : vector<2x8xf32>
    %77 = math.exp %76 : vector<2x8xf32>
    %cst_37 = arith.constant dense<0.000000e+00> : vector<2xf32>
    %78 = vector.multi_reduction <add>, %77, %cst_37 [1] : vector<2x8xf32> to vector<2xf32>
    %79 = vector.shape_cast %78 : vector<2xf32> to vector<2x1xf32>
    %80 = tpu.reciprocal %79 {approx = true} : vector<2x1xf32> -> vector<2x1xf32>
    %81 = vector.broadcast %80 : vector<2x1xf32> to vector<2x8xf32>
    %82 = arith.mulf %77, %81 : vector<2x8xf32>
    %83 = arith.mulf %82, %68 : vector<2x8xf32>
    %84 = vector.shape_cast %83 : vector<2x8xf32> to vector<2x8x1xf32>
    %85 = vector.broadcast %84 : vector<2x8x1xf32> to vector<2x8x64xf32>
    %86 = arith.mulf %85, %1 : vector<2x8x64xf32>
    %cst_38 = arith.constant dense<0.000000e+00> : vector<2x64xf32>
    %87 = vector.multi_reduction <add>, %86, %cst_38 [1] : vector<2x8x64xf32> to vector<2x64xf32>
    %88 = vector.shape_cast %68 : vector<2x8xf32> to vector<2x8x1xf32>
    %89 = vector.broadcast %88 : vector<2x8x1xf32> to vector<2x8x64xf32>
    %90 = arith.mulf %89, %1 : vector<2x8x64xf32>
    %cst_39 = arith.constant dense<0.000000e+00> : vector<2x64xf32>
    %91 = vector.multi_reduction <add>, %90, %cst_39 [1] : vector<2x8x64xf32> to vector<2x64xf32>
    %c0_40 = arith.constant 0 : index
    %c0_41 = arith.constant 0 : index
    %92 = vector.load %arg4[%c0_40, %c0_41] : memref<2x1xf32, #tpu.memory_space<vmem>>, vector<2x1xf32>
    %93 = tpu.reciprocal %92 {approx = true} : vector<2x1xf32> -> vector<2x1xf32>
    %94 = vector.broadcast %93 : vector<2x1xf32> to vector<2x64xf32>
    %95 = arith.mulf %91, %94 : vector<2x64xf32>
    %c0_42 = arith.constant 0 : index
    %c0_43 = arith.constant 0 : index
    %96 = vector.load %arg5[%c0_42, %c0_43] : memref<2x32xf32, #tpu.memory_space<vmem>>, vector<2x32xf32>
    %97 = tpu.concatenate %96, %2, %95, %87 in 1 : vector<2x32xf32>, vector<2x64xf32>, vector<2x64xf32>, vector<2x64xf32> -> vector<2x224xf32>
    %98 = arith.truncf %97 : vector<2x224xf32> to vector<2x224xbf16>
    %c0_44 = arith.constant 0 : index
    %c0_45 = arith.constant 0 : index
    %99 = vector.load %arg17[%c0_44, %c0_45] : memref<224x256xbf16, #tpu.memory_space<vmem>>, vector<224x256xbf16>
    %cst_46 = arith.constant dense<0.000000e+00> : vector<2x256xf32>
    %100 = tpu.matmul %98, %99, %cst_46 {dimension_numbers = #tpu.dot_dimension_numbers<[1], [0], [0], [1], [0, 0, 1, 1], [], []>} : vector<2x224xbf16>, vector<224x256xbf16>, vector<2x256xf32> -> vector<2x256xf32>
    %c0_47 = arith.constant 0 : index
    %c0_48 = arith.constant 0 : index
    %101 = vector.load %arg18[%c0_47, %c0_48] : memref<1x256xf32, #tpu.memory_space<vmem>>, vector<1x256xf32>
    %102 = vector.broadcast %101 : vector<1x256xf32> to vector<2x256xf32>
    %103 = arith.addf %100, %102 : vector<2x256xf32>
    %c0_49 = arith.constant 0 : index
    %c0_50 = arith.constant 0 : index
    %104 = vector.load %arg19[%c0_49, %c0_50] : memref<1x256xf32, #tpu.memory_space<vmem>>, vector<1x256xf32>
    %105 = vector.broadcast %104 : vector<1x256xf32> to vector<2x256xf32>
    %106 = arith.mulf %103, %105 : vector<2x256xf32>
    %c0_51 = arith.constant 0 : index
    %c0_52 = arith.constant 0 : index
    %107 = vector.load %arg20[%c0_51, %c0_52] : memref<1x256xf32, #tpu.memory_space<vmem>>, vector<1x256xf32>
    %108 = vector.broadcast %107 : vector<1x256xf32> to vector<2x256xf32>
    %109 = arith.addf %106, %108 : vector<2x256xf32>
    %110 = arith.negf %109 : vector<2x256xf32>
    %111 = math.exp %110 : vector<2x256xf32>
    %cst_53 = arith.constant 1.000000e+00 : f32
    %112 = vector.broadcast %cst_53 : f32 to vector<2x256xf32>
    %113 = arith.addf %112, %111 : vector<2x256xf32>
    %114 = arith.divf %112, %113 : vector<2x256xf32>
    %115 = arith.mulf %114, %103 : vector<2x256xf32>
    %116 = arith.truncf %115 : vector<2x256xf32> to vector<2x256xbf16>
    %c0_54 = arith.constant 0 : index
    %c0_55 = arith.constant 0 : index
    %117 = vector.load %arg21[%c0_54, %c0_55] : memref<256x128xbf16, #tpu.memory_space<vmem>>, vector<256x128xbf16>
    %cst_56 = arith.constant dense<0.000000e+00> : vector<2x128xf32>
    %118 = tpu.matmul %116, %117, %cst_56 {dimension_numbers = #tpu.dot_dimension_numbers<[1], [0], [0], [1], [0, 0, 1, 1], [], []>} : vector<2x256xbf16>, vector<256x128xbf16>, vector<2x128xf32> -> vector<2x128xf32>
    %c0_57 = arith.constant 0 : index
    %c0_58 = arith.constant 0 : index
    %119 = vector.load %arg22[%c0_57, %c0_58] : memref<1x128xf32, #tpu.memory_space<vmem>>, vector<1x128xf32>
    %120 = vector.broadcast %119 : vector<1x128xf32> to vector<2x128xf32>
    %121 = arith.addf %118, %120 : vector<2x128xf32>
    %c0_59 = arith.constant 0 : index
    %c0_60 = arith.constant 0 : index
    %122 = vector.load %arg23[%c0_59, %c0_60] : memref<1x128xf32, #tpu.memory_space<vmem>>, vector<1x128xf32>
    %123 = vector.broadcast %122 : vector<1x128xf32> to vector<2x128xf32>
    %124 = arith.mulf %121, %123 : vector<2x128xf32>
    %c0_61 = arith.constant 0 : index
    %c0_62 = arith.constant 0 : index
    %125 = vector.load %arg24[%c0_61, %c0_62] : memref<1x128xf32, #tpu.memory_space<vmem>>, vector<1x128xf32>
    %126 = vector.broadcast %125 : vector<1x128xf32> to vector<2x128xf32>
    %127 = arith.addf %124, %126 : vector<2x128xf32>
    %128 = arith.negf %127 : vector<2x128xf32>
    %129 = math.exp %128 : vector<2x128xf32>
    %cst_63 = arith.constant 1.000000e+00 : f32
    %130 = vector.broadcast %cst_63 : f32 to vector<2x128xf32>
    %131 = arith.addf %130, %129 : vector<2x128xf32>
    %132 = arith.divf %130, %131 : vector<2x128xf32>
    %133 = arith.mulf %132, %121 : vector<2x128xf32>
    %c0_64 = arith.constant 0 : index
    %c0_65 = arith.constant 0 : index
    %134 = vector.load %arg25[%c0_64, %c0_65] : memref<1x128xf32, #tpu.memory_space<vmem>>, vector<1x128xf32>
    %135 = vector.broadcast %134 : vector<1x128xf32> to vector<2x128xf32>
    %136 = arith.mulf %133, %135 : vector<2x128xf32>
    %cst_66 = arith.constant dense<0.000000e+00> : vector<2xf32>
    %137 = vector.multi_reduction <add>, %136, %cst_66 [1] : vector<2x128xf32> to vector<2xf32>
    %138 = vector.shape_cast %137 : vector<2xf32> to vector<2x1xf32>
    %c0_67 = arith.constant 0 : index
    %c0_68 = arith.constant 0 : index
    %139 = vector.load %arg26[%c0_67, %c0_68] : memref<1x1xf32, #tpu.memory_space<vmem>>, vector<1x1xf32>
    %140 = vector.broadcast %139 : vector<1x1xf32> to vector<2x1xf32>
    %141 = arith.addf %138, %140 : vector<2x1xf32>
    %c0_69 = arith.constant 0 : index
    %c0_70 = arith.constant 0 : index
    %142 = vector.load %arg27[%c0_69, %c0_70] : memref<2x1xf32, #tpu.memory_space<vmem>>, vector<2x1xf32>
    tpu.vector_store %arg27[%c0_69, %c0_70], %141 {strides = array<i32>} : memref<2x1xf32, #tpu.memory_space<vmem>>, vector<2x1xf32>,
    return
  }
  func.func @transform_0(%arg0: i32) -> (i32, i32) {
    %c0_i32 = arith.constant 0 : i32
    %c0_i32_0 = arith.constant 0 : i32
    return %arg0, %c0_i32 : i32, i32
  }
  func.func @transform_1(%arg0: i32) -> (i32, i32, i32) {
    %c0_i32 = arith.constant 0 : i32
    %c0_i32_0 = arith.constant 0 : i32
    %c0_i32_1 = arith.constant 0 : i32
    return %arg0, %c0_i32, %c0_i32_0 : i32, i32, i32
  }
  func.func @transform_2(%arg0: i32) -> (i32, i32) {
    %c0_i32 = arith.constant 0 : i32
    %c0_i32_0 = arith.constant 0 : i32
    return %arg0, %c0_i32 : i32, i32
  }
  func.func @transform_3(%arg0: i32) -> (i32, i32) {
    %c0_i32 = arith.constant 0 : i32
    %c0_i32_0 = arith.constant 0 : i32
    return %arg0, %c0_i32 : i32, i32
  }
  func.func @transform_4(%arg0: i32) -> (i32, i32) {
    %c0_i32 = arith.constant 0 : i32
    %c0_i32_0 = arith.constant 0 : i32
    return %arg0, %c0_i32 : i32, i32
  }
  func.func @transform_5(%arg0: i32) -> (i32, i32) {
    %c0_i32 = arith.constant 0 : i32
    %c0_i32_0 = arith.constant 0 : i32
    %c0_i32_1 = arith.constant 0 : i32
    return %c0_i32, %c0_i32_0 : i32, i32
  }
  func.func @transform_6(%arg0: i32) -> (i32, i32) {
    %c0_i32 = arith.constant 0 : i32
    %c0_i32_0 = arith.constant 0 : i32
    %c0_i32_1 = arith.constant 0 : i32
    return %c0_i32, %c0_i32_0 : i32, i32
  }
  func.func @transform_7(%arg0: i32) -> (i32, i32) {
    %c0_i32 = arith.constant 0 : i32
    %c0_i32_0 = arith.constant 0 : i32
    %c0_i32_1 = arith.constant 0 : i32
    return %c0_i32, %c0_i32_0 : i32, i32
  }
  func.func @transform_8(%arg0: i32) -> (i32, i32) {
    %c0_i32 = arith.constant 0 : i32
    %c0_i32_0 = arith.constant 0 : i32
    %c0_i32_1 = arith.constant 0 : i32
    return %c0_i32, %c0_i32_0 : i32, i32
  }
  func.func @transform_9(%arg0: i32) -> (i32, i32) {
    %c0_i32 = arith.constant 0 : i32
    %c0_i32_0 = arith.constant 0 : i32
    %c0_i32_1 = arith.constant 0 : i32
    return %c0_i32, %c0_i32_0 : i32, i32
  }
  func.func @transform_10(%arg0: i32) -> (i32, i32) {
    %c0_i32 = arith.constant 0 : i32
    %c0_i32_0 = arith.constant 0 : i32
    %c0_i32_1 = arith.constant 0 : i32
    return %c0_i32, %c0_i32_0 : i32, i32
  }
  func.func @transform_11(%arg0: i32) -> (i32, i32) {
    %c0_i32 = arith.constant 0 : i32
    %c0_i32_0 = arith.constant 0 : i32
    %c0_i32_1 = arith.constant 0 : i32
    return %c0_i32, %c0_i32_0 : i32, i32
  }
  func.func @transform_12(%arg0: i32) -> (i32, i32) {
    %c0_i32 = arith.constant 0 : i32
    %c0_i32_0 = arith.constant 0 : i32
    %c0_i32_1 = arith.constant 0 : i32
    return %c0_i32, %c0_i32_0 : i32, i32
  }
  func.func @transform_13(%arg0: i32) -> (i32, i32) {
    %c0_i32 = arith.constant 0 : i32
    %c0_i32_0 = arith.constant 0 : i32
    %c0_i32_1 = arith.constant 0 : i32
    return %c0_i32, %c0_i32_0 : i32, i32
  }
  func.func @transform_14(%arg0: i32) -> (i32, i32) {
    %c0_i32 = arith.constant 0 : i32
    %c0_i32_0 = arith.constant 0 : i32
    %c0_i32_1 = arith.constant 0 : i32
    return %c0_i32, %c0_i32_0 : i32, i32
  }
  func.func @transform_15(%arg0: i32) -> (i32, i32) {
    %c0_i32 = arith.constant 0 : i32
    %c0_i32_0 = arith.constant 0 : i32
    %c0_i32_1 = arith.constant 0 : i32
    return %c0_i32, %c0_i32_0 : i32, i32
  }
  func.func @transform_16(%arg0: i32) -> (i32, i32) {
    %c0_i32 = arith.constant 0 : i32
    %c0_i32_0 = arith.constant 0 : i32
    %c0_i32_1 = arith.constant 0 : i32
    return %c0_i32, %c0_i32_0 : i32, i32
  }
  func.func @transform_17(%arg0: i32) -> (i32, i32) {
    %c0_i32 = arith.constant 0 : i32
    %c0_i32_0 = arith.constant 0 : i32
    %c0_i32_1 = arith.constant 0 : i32
    return %c0_i32, %c0_i32_0 : i32, i32
  }
  func.func @transform_18(%arg0: i32) -> (i32, i32) {
    %c0_i32 = arith.constant 0 : i32
    %c0_i32_0 = arith.constant 0 : i32
    %c0_i32_1 = arith.constant 0 : i32
    return %c0_i32, %c0_i32_0 : i32, i32
  }
  func.func @transform_19(%arg0: i32) -> (i32, i32) {
    %c0_i32 = arith.constant 0 : i32
    %c0_i32_0 = arith.constant 0 : i32
    %c0_i32_1 = arith.constant 0 : i32
    return %c0_i32, %c0_i32_0 : i32, i32
  }
  func.func @transform_20(%arg0: i32) -> (i32, i32) {
    %c0_i32 = arith.constant 0 : i32
    %c0_i32_0 = arith.constant 0 : i32
    %c0_i32_1 = arith.constant 0 : i32
    return %c0_i32, %c0_i32_0 : i32, i32
  }
  func.func @transform_21(%arg0: i32) -> (i32, i32) {
    %c0_i32 = arith.constant 0 : i32
    %c0_i32_0 = arith.constant 0 : i32
    %c0_i32_1 = arith.constant 0 : i32
    return %c0_i32, %c0_i32_0 : i32, i32
  }
  func.func @transform_22(%arg0: i32) -> (i32, i32) {
    %c0_i32 = arith.constant 0 : i32
    %c0_i32_0 = arith.constant 0 : i32
    %c0_i32_1 = arith.constant 0 : i32
    return %c0_i32, %c0_i32_0 : i32, i32
  }
  func.func @transform_23(%arg0: i32) -> (i32, i32) {
    %c0_i32 = arith.constant 0 : i32
    %c0_i32_0 = arith.constant 0 : i32
    %c0_i32_1 = arith.constant 0 : i32
    return %c0_i32, %c0_i32_0 : i32, i32
  }
  func.func @transform_24(%arg0: i32) -> (i32, i32) {
    %c0_i32 = arith.constant 0 : i32
    %c0_i32_0 = arith.constant 0 : i32
    %c0_i32_1 = arith.constant 0 : i32
    return %c0_i32, %c0_i32_0 : i32, i32
  }
  func.func @transform_25(%arg0: i32) -> (i32, i32) {
    %c0_i32 = arith.constant 0 : i32
    %c0_i32_0 = arith.constant 0 : i32
    %c0_i32_1 = arith.constant 0 : i32
    return %c0_i32, %c0_i32_0 : i32, i32
  }
  func.func @transform_26(%arg0: i32) -> (i32, i32) {
    %c0_i32 = arith.constant 0 : i32
    %c0_i32_0 = arith.constant 0 : i32
    return %arg0, %c0_i32 : i32, i32
  }
}

</mosaic_0001>

<bundles_post_ra>
// kernel: tpu_custom_call.1
= control target key start
LH: loop header
LB: loop body
LE: loop exit
PB: predicated region body
PF: predicated region fallthrough
CT: control target
= control target key end

     0   :  { %s2253_s0 = inlined_call_operand.vmem [shape: f32[2,64], index: 0, kind: input, shape index: {}]   ;;  %s2254_s1 = inlined_call_operand.hbm [shape: bf16[2,8,64], index: 1, kind: input, shape index: {}]   ;;  %s2255_s2 = inlined_call_operand.hbm [shape: f32[2,8], index: 2, kind: input, shape index: {}]   ;;  %s2256_s3 = inlined_call_operand.vmem [shape: f32[2,1], index: 3, kind: input, shape index: {}]   ;;  %s2257_s4 = inlined_call_operand.hbm [shape: f32[2,32], index: 4, kind: input, shape index: {}]   ;;  %s2258_s5 = inlined_call_operand.hbm [shape: bf16[128,128], index: 5, kind: input, shape index: {}]   ;;  %s2259_s6 = inlined_call_operand.vmem [shape: bf16[64,128], index: 6, kind: input, shape index: {}]   ;;  %s2260_s7 = inlined_call_operand.vmem [shape: f32[1,128], index: 7, kind: input, shape index: {}]   ;;  %s2261_s8 = inlined_call_operand.hbm [shape: f32[1,128], index: 8, kind: input, shape index: {}]   ;;  %s2262_s9 = inlined_call_operand.vmem [shape: f32[1,128], index: 9, kind: input, shape index: {}]   ;;  %s2263_s10 = inlined_call_operand.hbm [shape: bf16[128,128], index: 10, kind: input, shape index: {}]   ;;  %s2264_s11 = inlined_call_operand.vmem [shape: f32[1,128], index: 11, kind: input, shape index: {}]   ;;  %s2265_s12 = inlined_call_operand.vmem [shape: f32[1,128], index: 12, kind: input, shape index: {}]   ;;  %s2266_s13 = inlined_call_operand.vmem [shape: f32[1,128], index: 13, kind: input, shape index: {}]   ;;  %s2267_s14 = inlined_call_operand.vmem [shape: f32[1,128], index: 14, kind: input, shape index: {}]   ;;  %s2268_s15 = inlined_call_operand.<no memory space> [shape: f32[1,1], index: 15, kind: input, shape index: {}]   ;;  %s2269_s16 = inlined_call_operand.hbm [shape: bf16[224,256], index: 16, kind: input, shape index: {}]   ;;  %s2270_s17 = inlined_call_operand.vmem [shape: f32[1,256], index: 17, kind: input, shape index: {}]   ;;  %s2271_s18 = inlined_call_operand.vmem [shape: f32[1,256], index: 18, kind: input, shape index: {}]   ;;  %s2272_s19 = inlined_call_operand.vmem [shape: f32[1,256], index: 19, kind: input, shape index: {}]   ;;  %s2273_s20 = inlined_call_operand.hbm [shape: bf16[256,128], index: 20, kind: input, shape index: {}]   ;;  %s2274_s21 = inlined_call_operand.vmem [shape: f32[1,128], index: 21, kind: input, shape index: {}]   ;;  %s2275_s22 = inlined_call_operand.vmem [shape: f32[1,128], index: 22, kind: input, shape index: {}]   ;;  %s2276_s23 = inlined_call_operand.vmem [shape: f32[1,128], index: 23, kind: input, shape index: {}]   ;;  %s2277_s24 = inlined_call_operand.vmem [shape: f32[1,128], index: 24, kind: input, shape index: {}]   ;;  %s2278_s26 = inlined_call_operand.vmem [shape: f32[2,1], index: 26, kind: output, shape index: {}]   ;;  %s2279_s25 = inlined_call_operand.<no memory space> [shape: f32[1,1], index: 25, kind: input, shape index: {}]  }
   0x1   :  { %2287 = sst [smem:[#allocation22_spill]] %s2253_s0  ;;  %v31_v0 = vstv %s2268_s15  ;;  %v33_v1 = vstv %s2279_s25 }
   0x2   :  { %2288 = sst [smem:[#allocation23_spill]] %s2254_s1  ;;  %32 = vst [vmem:[#allocation2] sm:$0x1] %v31_v0  ;;  %34 = vst [vmem:[#allocation3] sm:$0x1] %v33_v1 }
   0x3   :  { %2289 = sst [smem:[#allocation24_spill]] %s2255_s2 }
   0x4   :  { %2290 = sst [smem:[#allocation25_spill]] %s2256_s3 }
   0x5   :  { %2291 = sst [smem:[#allocation26_spill]] %s2257_s4 }
   0x6   :  { %2292 = sst [smem:[#allocation27_spill]] %s2258_s5 }
   0x7   :  { %2293 = sst [smem:[#allocation28_spill]] %s2259_s6 }
   0x8   :  { %2294 = sst [smem:[#allocation29_spill]] %s2260_s7 }
   0x9   :  { %2295 = sst [smem:[#allocation30_spill]] %s2261_s8 }
   0xa   :  { %2296 = sst [smem:[#allocation31_spill]] %s2262_s9 }
   0xb   :  { %2297 = sst [smem:[#allocation32_spill]] %s2263_s10 }
   0xc   :  { %2298 = sst [smem:[#allocation33_spill]] %s2278_s26 }
   0xd   :  { %35 = vsyncpa [#allocation5], 0 }
   0xe   :  { %36 = vsyncpa [#allocation7], 0 }
   0xf   :  { %37 = vsyncpa [#allocation10], 0 }
  0x10   :  { %38 = vsyncpa [#allocation13], 0 }
  0x11   :  { %39 = vsyncpa [#allocation16], 0  ;;  %s1837_s8 = smov [#allocation6]   ;;  %s2299_s9 = sld [smem:[#allocation24_spill]] }
  0x12   :  { %s60_s4 = sshll.u32 %s1837_s8, 4  ;;  %s61_s4 = int_to_ptr.vmem [resolvable:$true] %s60_s4 }
  0x17   :  { %s1651_s30 = scalar_lea.hbm %s2299_s9, 32 }
  0x18   :  { %p1652_p0 = scmp.ne.s32.totalorder %s2299_s9, %s1651_s30  ;;  %p1655_p1 = scmp.lt.u32.totalorder %s1651_s30, %s2299_s9 }
  0x1a   :  { %p1657_p2 = pnand %p1655_p1, %p1652_p0 }
  0x1c   :  { %1660 = shalt.err (!%p1657_p2)
}
  0x1d   :  { %s1661_s10 = scalar_lea.vmem %s61_s4, 32  ;;  %p1666_p4 = scmp.lt.s32.totalorder %s61_s4, %s61_s4 }
  0x1e   :  { %p1662_p3 = scmp.ne.s32.totalorder %s61_s4, %s1661_s10  ;;  %p1667_p5 = scmp.lt.s32.totalorder %s1661_s10, %s1661_s10 }
  0x20   :  { %p1668_p6 = por %p1667_p5, %p1666_p4 }
  0x22   :  { %p1669_p7 = pnand %p1668_p6, %p1662_p3 }
  0x24   :  { %1672 = shalt.err (!%p1669_p7)
}
  0x25   :  { %63 = dma.hbm_to_vmem [thread:$0]  %s2299_s9, 32, %s61_s4, [#allocation7]  }
  0x26   :  { %s1838_s27 = smov [#allocation9]   ;;  %s1839_s7 = smov [#allocation12]  }
  0x27   :  { %s81_s3 = sshll.u32 %s1838_s27, 4  ;;  %s109_s28 = sshll.u32 %s1839_s7, 4  ;;  %s82_s3 = int_to_ptr.vmem [resolvable:$true] %s81_s3  ;;  %s110_s28 = int_to_ptr.vmem [resolvable:$true] %s109_s28 }
  0x28   :  { %s2300_s0 = sld [smem:[#allocation27_spill]] }
  0x2e   :  { %s1673_s30 = scalar_lea.hbm %s2300_s0, 1024 }
  0x2f   :  { %p1674_p8 = scmp.ne.s32.totalorder %s2300_s0, %s1673_s30  ;;  %p1677_p9 = scmp.lt.u32.totalorder %s1673_s30, %s2300_s0 }
  0x31   :  { %p1679_p10 = pnand %p1677_p9, %p1674_p8 }
  0x33   :  { %1682 = shalt.err (!%p1679_p10)
}
  0x34   :  { %s1683_s4 = scalar_lea.vmem %s82_s3, 1024  ;;  %p1688_p12 = scmp.lt.s32.totalorder %s82_s3, %s82_s3 }
  0x35   :  { %p1684_p11 = scmp.ne.s32.totalorder %s82_s3, %s1683_s4  ;;  %p1689_p13 = scmp.lt.s32.totalorder %s1683_s4, %s1683_s4 }
  0x37   :  { %p1690_p0 = por %p1689_p13, %p1688_p12 }
  0x39   :  { %p1691_p1 = pnand %p1690_p0, %p1684_p11 }
  0x3b   :  { %1694 = shalt.err (!%p1691_p1)
}
  0x3c   :  { %s1840_s9 = smov 64   ;;  %s1841_s10 = smov 4  }
  0x3d   :  { %87 = dma.hbm_to_vmem [thread:$0]  %s2300_s0, 1024, %s82_s3, [#allocation10], %s1840_s9, %s1840_s9, %s1841_s10  }
  0x3e   :  { %s2301_s8 = sld [smem:[#allocation32_spill]] }
  0x44   :  { %s1695_s29 = scalar_lea.hbm %s2301_s8, 1024 }
  0x45   :  { %p1696_p2 = scmp.ne.s32.totalorder %s2301_s8, %s1695_s29  ;;  %p1699_p3 = scmp.lt.u32.totalorder %s1695_s29, %s2301_s8 }
  0x47   :  { %p1701_p4 = pnand %p1699_p3, %p1696_p2 }
  0x49   :  { %1704 = shalt.err (!%p1701_p4)
}
  0x4a   :  { %s1705_s25 = scalar_lea.vmem %s110_s28, 1024  ;;  %p1710_p6 = scmp.lt.s32.totalorder %s110_s28, %s110_s28 }
  0x4b   :  { %p1706_p5 = scmp.ne.s32.totalorder %s110_s28, %s1705_s25  ;;  %p1711_p7 = scmp.lt.s32.totalorder %s1705_s25, %s1705_s25 }
  0x4d   :  { %p1712_p8 = por %p1711_p7, %p1710_p6 }
  0x4f   :  { %p1713_p9 = pnand %p1712_p8, %p1706_p5 }
  0x51   :  { %1716 = shalt.err (!%p1713_p9)
}
  0x52   :  { %115 = dma.hbm_to_vmem [thread:$0]  %s2301_s8, 1024, %s110_s28, [#allocation13], %s1840_s9, %s1840_s9, %s1841_s10  }
  0x53   :  { %s1842_s4 = smov [#allocation4]   ;;  %s1843_s1 = smov [#allocation8]  }
  0x54   :  { %s47_s6 = sshll.u32 %s1842_s4, 4  ;;  %s72_s27 = sshll.u32 %s1843_s1, 4  ;;  %s48_s6 = int_to_ptr.vmem [resolvable:$true] %s47_s6  ;;  %s73_s27 = int_to_ptr.vmem [resolvable:$true] %s72_s27 }
  0x55   :  { %s2302_s30 = sld [smem:[#allocation23_spill]] }
  0x5b   :  { %s1717_s2 = scalar_lea.hbm %s2302_s30, 128 }
  0x5c   :  { %p1718_p10 = scmp.ne.s32.totalorder %s2302_s30, %s1717_s2  ;;  %p1721_p11 = scmp.lt.u32.totalorder %s1717_s2, %s2302_s30 }
  0x5e   :  { %p1723_p12 = pnand %p1721_p11, %p1718_p10 }
  0x60   :  { %1726 = shalt.err (!%p1723_p12)
}
  0x61   :  { %s1727_s28 = scalar_lea.vmem %s48_s6, 128  ;;  %p1732_p0 = scmp.lt.s32.totalorder %s48_s6, %s48_s6 }
  0x62   :  { %p1728_p13 = scmp.ne.s32.totalorder %s48_s6, %s1727_s28  ;;  %p1733_p1 = scmp.lt.s32.totalorder %s1727_s28, %s1727_s28 }
  0x64   :  { %p1734_p2 = por %p1733_p1, %p1732_p0 }
  0x66   :  { %p1735_p3 = pnand %p1734_p2, %p1728_p13 }
  0x68   :  { %1738 = shalt.err (!%p1735_p3)
}
  0x69   :  { %53 = dma.hbm_to_vmem [thread:$0]  %s2302_s30, 128, %s48_s6, [#allocation5], %s1840_s9, %s1840_s9, %s1841_s10  }
  0x6a   :  { %s2303_s4 = sld [smem:[#allocation26_spill]] }
  0x70   :  { %s1739_s1 = scalar_lea.hbm %s2303_s4, 32 }
  0x71   :  { %p1740_p4 = scmp.ne.s32.totalorder %s2303_s4, %s1739_s1  ;;  %p1743_p5 = scmp.lt.u32.totalorder %s1739_s1, %s2303_s4 }
  0x73   :  { %p1745_p6 = pnand %p1743_p5, %p1740_p4 }
  0x75   :  { %1748 = shalt.err (!%p1745_p6)
}
  0x76   :  { %s1749_s5 = scalar_lea.vmem %s73_s27, 32  ;;  %p1754_p8 = scmp.lt.s32.totalorder %s73_s27, %s73_s27 }
  0x77   :  { %p1750_p7 = scmp.ne.s32.totalorder %s73_s27, %s1749_s5  ;;  %p1755_p9 = scmp.lt.s32.totalorder %s1749_s5, %s1749_s5 }
  0x79   :  { %p1756_p10 = por %p1755_p9, %p1754_p8 }
  0x7b   :  { %p1757_p11 = pnand %p1756_p10, %p1750_p7 }
  0x7d   :  { %1760 = shalt.err (!%p1757_p11)
}
  0x7e   :  { %75 = dma.hbm_to_vmem [thread:$0]  %s2303_s4, 32, %s73_s27, [#allocation7]  }
  0x7f   :  { %s1844_s25 = smov [#allocation11]   ;;  %s1845_s8 = smov [#allocation14]  }
  0x80   :  { %s98_s28 = sshll.u32 %s1844_s25, 4  ;;  %s131_s3 = sshll.u32 %s1845_s8, 4  ;;  %s99_s28 = int_to_ptr.vmem [resolvable:$true] %s98_s28  ;;  %s132_s3 = int_to_ptr.vmem [resolvable:$true] %s131_s3 }
  0x81   :  { %s2304_s1 = sld [smem:[#allocation30_spill]] }
  0x87   :  { %s1761_s7 = scalar_lea.hbm %s2304_s1, 16 }
  0x88   :  { %p1762_p12 = scmp.ne.s32.totalorder %s2304_s1, %s1761_s7  ;;  %p1765_p13 = scmp.lt.u32.totalorder %s1761_s7, %s2304_s1 }
  0x8a   :  { %p1767_p0 = pnand %p1765_p13, %p1762_p12 }
  0x8c   :  { %1770 = shalt.err (!%p1767_p0)
}
  0x8d   :  { %s1771_s27 = scalar_lea.vmem %s99_s28, 16  ;;  %s1775_s4 = scalar_lea.vmem %s99_s28, 32 }
  0x8e   :  { %p1772_p1 = scmp.ne.s32.totalorder %s99_s28, %s1771_s27  ;;  %p1776_p2 = scmp.lt.s32.totalorder %s99_s28, %s99_s28 }
  0x8f   :  { %p1777_p3 = scmp.lt.s32.totalorder %s1775_s4, %s1771_s27 }
  0x91   :  { %p1778_p4 = por %p1777_p3, %p1776_p2 }
  0x93   :  { %p1779_p5 = pnand %p1778_p4, %p1772_p1 }
  0x95   :  { %1782 = shalt.err (!%p1779_p5)
}
  0x96   :  { %101 = dma.hbm_to_vmem [thread:$0]  %s2304_s1, 16, %s99_s28, [#allocation10]  }
  0x97   :  { %s1783_s0 = scalar_lea.hbm %s2269_s16, 3584 }
  0x98   :  { %p1784_p6 = scmp.ne.s32.totalorder %s2269_s16, %s1783_s0  ;;  %p1787_p7 = scmp.lt.u32.totalorder %s1783_s0, %s2269_s16 }
  0x9a   :  { %p1789_p8 = pnand %p1787_p7, %p1784_p6 }
  0x9c   :  { %1792 = shalt.err (!%p1789_p8)
}
  0x9d   :  { %s1793_s15 = scalar_lea.vmem %s132_s3, 3584  ;;  %p1798_p10 = scmp.lt.s32.totalorder %s132_s3, %s132_s3 }
  0x9e   :  { %p1794_p9 = scmp.ne.s32.totalorder %s132_s3, %s1793_s15  ;;  %p1799_p11 = scmp.lt.s32.totalorder %s1793_s15, %s1793_s15 }
  0xa0   :  { %p1800_p12 = por %p1799_p11, %p1798_p10 }
  0xa2   :  { %p1801_p13 = pnand %p1800_p12, %p1794_p9 }
  0xa4   :  { %1804 = shalt.err (!%p1801_p13)
}
  0xa5   :  { %s1846_s28 = smov 128   ;;  %s1847_s1 = smov 8  }
  0xa6   :  { %137 = dma.hbm_to_vmem [thread:$0]  %s2269_s16, 3584, %s132_s3, [#allocation13], %s1846_s28, %s1846_s28, %s1847_s1  }
  0xa7   :  { %s1848_s4 = smov [#allocation15]   ;;  %s1805_s8 = scalar_lea.hbm %s2273_s20, 2048 }
  0xa8   :  { %s149_s6 = sshll.u32 %s1848_s4, 4  ;;  %p1806_p0 = scmp.ne.s32.totalorder %s2273_s20, %s1805_s8  ;;  %s150_s6 = int_to_ptr.vmem [resolvable:$true] %s149_s6 }
  0xa9   :  { %p1809_p1 = scmp.lt.u32.totalorder %s1805_s8, %s2273_s20 }
  0xab   :  { %p1811_p2 = pnand %p1809_p1, %p1806_p0 }
  0xad   :  { %1814 = shalt.err (!%p1811_p2)
}
  0xae   :  { %s1815_s2 = scalar_lea.vmem %s150_s6, 2048  ;;  %p1820_p4 = scmp.lt.s32.totalorder %s150_s6, %s150_s6 }
  0xaf   :  { %p1816_p3 = scmp.ne.s32.totalorder %s150_s6, %s1815_s2  ;;  %p1821_p5 = scmp.lt.s32.totalorder %s1815_s2, %s1815_s2 }
  0xb1   :  { %p1822_p6 = por %p1821_p5, %p1820_p4 }
  0xb3   :  { %p1823_p7 = pnand %p1822_p6, %p1816_p3 }
  0xb5   :  { %1826 = shalt.err (!%p1823_p7)
}
  0xb6   :  { %155 = dma.hbm_to_vmem [thread:$0]  %s2273_s20, 2048, %s150_s6, [#allocation16], %s1840_s9, %s1840_s9, %s1841_s10  }
  0xb7   :  { %1827 = dma.done.wait [#allocation5], 128  }
  0xb8   :  { %1828 = vsyncadd [#allocation5], 4294967168 }
  0xb9   :  { %1829 = dma.done.wait [#allocation7], 64  }
  0xba   :  { %1830 = vsyncadd [#allocation7], 4294967232 }
  0xbb   :  { %1831 = dma.done.wait [#allocation10], 1040  }
  0xbc   :  { %1832 = vsyncadd [#allocation10], 4294966256 }
  0xbd   :  { %1833 = dma.done.wait [#allocation13], 4608  }
  0xbe   :  { %1834 = vsyncadd [#allocation13], 4294962688 }
  0xbf   :  { %1835 = dma.done.wait [#allocation16], 2048  }
  0xc0   :  { %1836 = vsyncadd [#allocation16], 4294965248  ;;  %v201_v2 = vlaneseq  ;;  %v1849_v3 = vmov 1966171168   ;;  %v1850_v5 = vmov 0.0   ;;  %vm1851_vm0 = vmmov 0  }
  0xc1   :  { %v199_v4 = vunpack.c.l.s4 %v1849_v3  ;;  %1461 = vmatprep.subr.bf16.mxu1 %v1850_v5  ;;  %1449 = vmatprep.subr.bf16.mxu0 %v1850_v5  ;;  %v1401_v9 = vld [vmem:[#allocation4] sm:$0xff]   ;;  %s2305_s15 = sld [smem:[#allocation22_spill]]  ;;  %v1531_v13 = vld [vmem:[#allocation9] sm:$0xff]   ;;  %v1532_v14 = vld [vmem:[#allocation9 + $0x8] sm:$0xff]   ;;  %s2306_s5 = sld [smem:[#allocation28_spill]]  ;;  %vm240_vm1 = vcmask 523264  }
  0xc2   :  { %v2107_v6 = vshrl.u32 %v201_v2, 7  ;;  %1457 = vmatprep.mubr.msk.bf16.mxu0 %vm1851_vm0, %v1850_v5  ;;  %1477 = vmatprep.mubr.msk.bf16.mxu1 %vm1851_vm0, %v1850_v5  ;;  %v2126_v15 = vunpack.c.l.bf16 %v1401_v9  ;;  %v2133_v19 = vunpack.c.h.bf16 %v1401_v9  ;;  %v1534_v25 = vld [vmem:[#allocation9 + $0x10] sm:$0xff]   ;;  %v1536_v29 = vld [vmem:[#allocation9 + $0x18] sm:$0xff]   ;;  %v1538_v31 = vld [vmem:[#allocation9 + $0x20] sm:$0xff]   ;;  %s2307_s26 = sld [smem:[#allocation29_spill]]  ;;  %s2308_s2 = sld [smem:[#allocation31_spill]] }
  0xc3   :  { %v200_v7 = vunpack.c.0.s8 %v199_v4  ;;  %1462 = vmatpush3.bf16.msra.mxu1 %v1531_v13  ;;  %v1540_v33 = vld [vmem:[#allocation9 + $0x28] sm:$0xff]   ;;  %v1541_v34 = vld [vmem:[#allocation9 + $0x30] sm:$0xff]   ;;  %v1542_v35 = vld [vmem:[#allocation9 + $0x38] sm:$0xff]   ;;  %vm701_vm2 = vcmask 1041409   ;;  %vm705_vm4 = vcmask 58368   ;;  %s2309_s1 = sld [smem:[#allocation25_spill]] }
  0xc4   :  { %v2124_v12 = vsub.s32 0, %v2107_v6  ;;  %1463 = vmatprep.subr.bf16.mxu1 %v1850_v5  ;;  %v1543_v42 = vld [vmem:[#allocation12] sm:$0xff]   ;;  %v1544_v43 = vld [vmem:[#allocation12 + $0x8] sm:$0xff]   ;;  %v1545_v44 = vld [vmem:[#allocation12 + $0x10] sm:$0xff]   ;;  %s1854_s27 = smov 96   ;;  %vm806_vm5 = vcmask 261120  }
  0xc5   :  { %v2114_v8 = vsub.s32 %v200_v7, %v2107_v6  ;;  %v1546_v49 = vld [vmem:[#allocation12 + $0x18] sm:$0xff]   ;;  %v1547_v50 = vld [vmem:[#allocation12 + $0x20] sm:$0xff]   ;;  %v1548_v51 = vld [vmem:[#allocation12 + $0x28] sm:$0xff]   ;;  %vm808_vm6 = vcmask 785408   ;;  %vm1287_vm7 = vcmask 1041408   ;;  %vm1299_vm8 = vcmask 1024  }
  0xc6   :  { %v1549_v52 = vld [vmem:[#allocation12 + $0x30] sm:$0xff]   ;;  %v1550_v53 = vld [vmem:[#allocation12 + $0x38] sm:$0xff]  }
  0xc7   :  { %v2119_v10 = vld [vmem:[%s2305_s15] sm:$0x3]  ;;  %v1535_v22 = vld [vmem:[%s2306_s5 + $0x8] sm:$0xff]   ;;  %1464 = vmatpush3.bf16.msra.mxu1 %v1532_v14  ;;  %v1537_v27 = vld [vmem:[%s2306_s5 + $0x10] sm:$0xff]  }
  0xc8   :  { %v204_v11 = vrot.slane %v2119_v10, %v2114_v8  ;;  %v1533_v18 = vld [vmem:[%s2306_s5] sm:$0xff]   ;;  %1465 = vmatprep.subr.bf16.mxu1 %v1850_v5  ;;  %v1539_v30 = vld [vmem:[%s2306_s5 + $0x18] sm:$0xff]   ;;  %v196_v32 = vpack.c.bf16 %v2119_v10, %v2119_v10  ;;  %v1325_v63 = vld [vmem:[#allocation11] ss:$0 sm:$0xff]  ;;  %s1853_s5 = smov 32  }
  0xc9   :  { %1450 = vmatpush3.bf16.msra.mxu0 %v1533_v18  ;;  %v1310_v54 = vld [vmem:[%s2307_s26] ss:$0 sm:$0xff] }
  0xca   :  { %v205_v16 = vcombine.high %v204_v11, %v204_v11  ;;  %v212_v17 = vrot.slane %v204_v11, %v2114_v8  ;;  %1451 = vmatprep.subr.bf16.mxu0 %v1850_v5  ;;  %v1326_v3 = vld [vmem:[%s2308_s2] ss:$0 sm:$0xff]  ;;  %s2310_s2 = sld [smem:[#allocation33_spill]] }
  0xcb   :  { %1466 = vmatpush3.bf16.msra.mxu1 %v1534_v25 }
  0xcc   :  { %v219_v20 = vrot.slane %v205_v16, %v2114_v8  ;;  %v223_v21 = vrot.slane %v212_v17, %v2124_v12  ;;  %1467 = vmatprep.subr.bf16.mxu1 %v1850_v5 }
  0xcd   :  { %1452 = vmatpush3.bf16.msra.mxu0 %v1535_v22 }
  0xce   :  { %v227_v23 = vrot.slane %v219_v20, %v2124_v12  ;;  %v230_v24 = vmul.f32 %v2126_v15, %v223_v21  ;;  %1453 = vmatprep.subr.bf16.mxu0 %v1850_v5 }
  0xcf   :  { %1468 = vmatpush3.bf16.msra.mxu1 %v1536_v29 }
  0xd0   :  { %v231_v26 = vmul.f32 %v2133_v19, %v227_v23  ;;  %1469 = vmatprep.subr.bf16.mxu1 %v1850_v5 }
  0xd1   :  { %1454 = vmatpush3.bf16.msra.mxu0 %v1537_v27  ;;  %v1852_v27 = vmov 0  }
  0xd2   :  { %v1519_v28 = vpack.i.bf16 %v231_v26, %v230_v24  ;;  %1455 = vmatprep.subr.bf16.mxu0 %v1850_v5  ;;  %1524 = vset.pattern.permute.xlu1 %v1852_v27 }
  0xd3   :  { %1470 = vmatpush3.bf16.msra.mxu1 %v1538_v31  ;;  %1525 = vset.pattern.permute.xlu0 %v1852_v27 }
  0xd4   :  { %1520 = vrot.lane.b32.xlu0 %v1519_v28, %s1840_s9  ;;  %1471 = vmatprep.subr.bf16.mxu1 %v1850_v5  ;;  %v1329_v28 = vld [vmem:[%s2264_s11] ss:$0 sm:$0xff] }
  0xd5   :  { %1456 = vmatpush3.bf16.msra.mxu0 %v1539_v30  ;;  %v1338_v30 = vld [vmem:[%s2265_s12] ss:$0 sm:$0xff] }
  0xd6   :  { %1481 = vmatprep.subr.bf16.mxu0 %v1850_v5 }
  0xd7   :  { %1472 = vmatpush3.bf16.msra.mxu1 %v1540_v33  ;;  %v1339_v33 = vld [vmem:[%s2266_s13] ss:$0 sm:$0xff] }
  0xd8   :  { %1458 = vmatmul.mubr.msk.bf16.vlgmr.msra.gmra.mrb[0].mxu0 %vm240_vm1, %v196_v32  ;;  %1473 = vmatprep.subr.bf16.mxu1 %v1850_v5 }
  0xd9   :  { %1497 = vmatprep.mubr.msk.bf16.mxu0 %vm1851_vm0, %v1850_v5  ;;  %1482 = vmatpush3.bf16.msra.mxu0 %v1543_v42 }
  0xda   :  { %1483 = vmatprep.subr.bf16.mxu0 %v1850_v5 }
  0xdb   :  { %1474 = vmatpush3.bf16.msra.mxu1 %v1541_v34 }
  0xdc   :  { %1475 = vmatprep.subr.bf16.mxu1 %v1850_v5 }
  0xdd   :  { %1484 = vmatpush3.bf16.msra.mxu0 %v1544_v43 }
  0xde   :  { %1485 = vmatprep.subr.bf16.mxu0 %v1850_v5 }
  0xdf   :  { %1476 = vmatpush3.bf16.msra.mxu1 %v1542_v35 }
  0xe1   :  { %1486 = vmatpush3.bf16.msra.mxu0 %v1545_v44 }
  0xe2   :  { %1487 = vmatprep.subr.bf16.mxu0 %v1850_v5 }
  0xe5   :  { %1488 = vmatpush3.bf16.msra.mxu0 %v1546_v49 }
  0xe6   :  { %1489 = vmatprep.subr.bf16.mxu0 %v1850_v5 }
  0xe9   :  { %1490 = vmatpush3.bf16.msra.mxu0 %v1547_v50 }
  0xea   :  { %1491 = vmatprep.subr.bf16.mxu0 %v1850_v5 }
  0xed   :  { %1492 = vmatpush3.bf16.msra.mxu0 %v1548_v51 }
  0xee   :  { %1493 = vmatprep.subr.bf16.mxu0 %v1850_v5 }
  0xf1   :  { %1494 = vmatpush3.bf16.msra.mxu0 %v1549_v52 }
  0xf2   :  { %1495 = vmatprep.subr.bf16.mxu0 %v1850_v5 }
  0xf5   :  { %1496 = vmatpush3.bf16.msra.mxu0 %v1550_v53 }
 0x146   :  { %v1521_v36 = vpop.permute.xlu0 %1520 }
 0x147   :  { %v1523_v37 = vunpack.i.h.bf16 %v1521_v36  ;;  %v1522_v38 = vunpack.i.l.bf16 %v1521_v36 }
 0x149   :  { %v241_v39 = vsel %vm240_vm1, %v2126_v15, %v1522_v38  ;;  %v242_v40 = vsel %vm240_vm1, %v2133_v19, %v1523_v37 }
 0x14a   :  { %v1399_v41 = vpack.c.bf16 %v242_v40, %v241_v39 }
 0x14c   :  { %1478 = vmatmul.mubr.bf16.vlgmr.msra.gmra.mrb[0].mxu1 %v1399_v41 }
 0x1ab   :  { %v321_v45 = vpop.f32.mrb[0].mxu0 }
 0x1ac   :  { %v1459_v46 = vpop.f32.mrb[1].mxu0  ;;  %v322_v55 = vadd.f32 %v1310_v54, %v321_v45  ;;  %v1343_v54 = vld [vmem:[#allocation2] ss:$0 sm:$0xff] }
 0x1ad   :  { %v324_v47 = vpop.f32.mrb[2].mxu0 }
 0x1ae   :  { %v1460_v48 = vpop.f32.mrb[3].mxu0  ;;  %v445_v56 = vrot.slane %v322_v55, %v2114_v8 }
 0x1af   :  { %v1342_v48 = vld [vmem:[%s2267_s14] ss:$0 sm:$0xff] }
 0x1b0   :  { %v446_v57 = vcombine.high %v445_v56, %v445_v56  ;;  %v453_v58 = vrot.slane %v445_v56, %v2114_v8 }
 0x1b2   :  { %v460_v59 = vrot.slane %v446_v57, %v2114_v8  ;;  %v464_v60 = vrot.slane %v453_v58, %v2124_v12 }
 0x1b4   :  { %v468_v61 = vrot.slane %v460_v59, %v2124_v12 }
 0x21f   :  { %v431_v62 = vpop.f32.mrb[0].mxu1 }
 0x220   :  { %v471_v0 = vadd.f32 %v464_v60, %v431_v62  ;;  %v1479_v1 = vpop.f32.mrb[1].mxu1 }
 0x221   :  { %v434_v4 = vpop.f32.mrb[2].mxu1 }
 0x222   :  { %v480_v5 = vmul.f32 %v1325_v63, %v471_v0  ;;  %v472_v7 = vadd.f32 %v468_v61, %v434_v4  ;;  %v1480_v9 = vpop.f32.mrb[3].mxu1 }
 0x224   :  { %v489_v11 = vadd.f32 %v1326_v3, %v480_v5  ;;  %v481_v13 = vmul.f32 %v1325_v63, %v472_v7  ;;  %v687_v5 = vld [vmem:[#allocation6] sm:$0x3] }
 0x225   :  { %vm688_vm3 = vcmp.eq.f32.partialorder %v687_v5, 1.0 }
 0x226   :  { %v1327_v14 = vmul.f32 -1.442695, %v489_v11  ;;  %v490_v8 = vadd.f32 %v1326_v3, %v481_v13  ;;  %v692_v3 = vand.u32 127, %v201_v2 }
 0x228   :  { %1609 = vpow2.f32 %v1327_v14  ;;  %v1328_v16 = vmul.f32 -1.442695, %v490_v8  ;;  %v695_v4 = vsub.s32 %v692_v3, %v2107_v6 }
 0x22a   :  { %1611 = vpow2.f32 %v1328_v16 }
 0x232   :  { %v1610_v17 = vpop.eup %1609 }
 0x233   :  { %v497_v18 = vadd.f32 1.0, %v1610_v17 }
 0x234   :  { %v1612_v20 = vpop.eup %1611 }
 0x235   :  { %1613 = vrcp.f32 %v497_v18  ;;  %v498_v21 = vadd.f32 1.0, %v1612_v20 }
 0x237   :  { %1615 = vrcp.f32 %v498_v21 }
 0x23f   :  { %v1614_v22 = vpop.eup %1613 }
 0x240   :  { %v503_v24 = vmul.f32 %v1614_v22, %v471_v0  ;;  %v2203_v22 = vsub.s32 1, %v2107_v6 }
 0x241   :  { %v1616_v23 = vpop.eup %1615 }
 0x242   :  { %v504_v25 = vmul.f32 %v1616_v23, %v472_v7  ;;  %v758_v23 = vrot.slane %v687_v5, %v2203_v22 }
 0x244   :  { %v505_v26 = vpack.c.bf16 %v504_v25, %v503_v24  ;;  %v751_v24 = vrot.slane %v687_v5, %v2124_v12 }
 0x246   :  { %1498 = vmatmul.mubr.bf16.vlgmr.msra.gmra.mrb[4].mxu0 %v505_v26  ;;  %v778_v26 = vld [vmem:[%s2309_s1] sm:$0x3] }
 0x319   :  { %v611_v29 = vpop.f32.mrb[4].mxu0 }
 0x31a   :  { %v612_v31 = vadd.f32 %v1329_v28, %v611_v29  ;;  %v1499_v32 = vpop.f32.mrb[5].mxu0 }
 0x31b   :  { %v614_v34 = vpop.f32.mrb[6].mxu0  ;;  %v1551_v32 = vld [vmem:[#allocation14] ss:$8 sps:$4 sm:$0xff]  }
 0x31c   :  { %v625_v35 = vmul.f32 %v1338_v30, %v612_v31  ;;  %v615_v36 = vadd.f32 %v1329_v28, %v614_v34  ;;  %v1500_v37 = vpop.f32.mrb[7].mxu0  ;;  %v1556_v34 = vld [vmem:[#allocation14 + $0x14] ss:$8 sps:$4 sm:$0xff]  }
 0x31d   :  { %v1557_v37 = vld [vmem:[#allocation14 + $0x20] ss:$8 sps:$4 sm:$0xff]  }
 0x31e   :  { %v634_v38 = vadd.f32 %v1339_v33, %v625_v35  ;;  %v626_v39 = vmul.f32 %v1338_v30, %v615_v36  ;;  %v1554_v35 = vld [vmem:[#allocation14 + $0x10] ss:$8 sps:$4 sm:$0xff]  }
 0x320   :  { %v1340_v40 = vmul.f32 -1.442695, %v634_v38  ;;  %v635_v41 = vadd.f32 %v1339_v33, %v626_v39  ;;  %v1553_v33 = vld [vmem:[#allocation14 + $0x4] ss:$8 sps:$4 sm:$0xff]   ;;  %v1562_v38 = vld [vmem:[#allocation14 + $0x34] ss:$8 sps:$4 sm:$0xff]  }
 0x321   :  { %996 = vmatprep.subr.bf16.mxu1 %v1553_v33  ;;  %v1560_v39 = vld [vmem:[#allocation14 + $0x30] ss:$8 sps:$4 sm:$0xff]  }
 0x322   :  { %1617 = vpow2.f32 %v1340_v40  ;;  %v1341_v42 = vmul.f32 -1.442695, %v635_v41  ;;  %997 = vmatpush1.bf16.msra.mxu1 %v1551_v32  ;;  %v1565_v40 = vld [vmem:[#allocation14 + $0x44] ss:$8 sps:$4 sm:$0xff]   ;;  %v1563_v41 = vld [vmem:[#allocation14 + $0x40] ss:$8 sps:$4 sm:$0xff]  }
 0x323   :  { %998 = vmatprep.subr.bf16.mxu1 %v1556_v34 }
 0x324   :  { %1619 = vpow2.f32 %v1341_v42  ;;  %v1568_v42 = vld [vmem:[#allocation14 + $0x54] ss:$8 sps:$4 sm:$0xff]  }
 0x326   :  { %999 = vmatpush1.bf16.msra.mxu1 %v1554_v35 }
 0x32c   :  { %v1618_v43 = vpop.eup %1617 }
 0x32d   :  { %v642_v44 = vadd.f32 1.0, %v1618_v43  ;;  %v1566_v43 = vld [vmem:[#allocation14 + $0x50] ss:$8 sps:$4 sm:$0xff]  }
 0x32e   :  { %v1620_v45 = vpop.eup %1619 }
 0x32f   :  { %1621 = vrcp.f32 %v642_v44  ;;  %v643_v46 = vadd.f32 1.0, %v1620_v45  ;;  %v1571_v44 = vld [vmem:[#allocation14 + $0x64] ss:$8 sps:$4 sm:$0xff]   ;;  %v1569_v45 = vld [vmem:[#allocation14 + $0x60] ss:$8 sps:$4 sm:$0xff]  }
 0x331   :  { %1623 = vrcp.f32 %v643_v46  ;;  %v1574_v46 = vld [vmem:[#allocation14 + $0x74] ss:$8 sps:$4 sm:$0xff]  }
 0x339   :  { %v1622_v47 = vpop.eup %1621 }
 0x33a   :  { %v648_v49 = vmul.f32 %v1622_v47, %v612_v31  ;;  %v1572_v47 = vld [vmem:[#allocation14 + $0x70] ss:$8 sps:$4 sm:$0xff]  }
 0x33b   :  { %v1624_v50 = vpop.eup %1623 }
 0x33c   :  { %v657_v51 = vmul.f32 %v1342_v48, %v648_v49  ;;  %v649_v52 = vmul.f32 %v1624_v50, %v615_v36  ;;  %v1559_v36 = vld [vmem:[#allocation14 + $0x24] ss:$8 sps:$4 sm:$0xff]   ;;  %v1575_v49 = vld [vmem:[#allocation14 + $0x80] ss:$8 sps:$4 sm:$0xff]   ;;  %v1580_v50 = vld [vmem:[#allocation14 + $0x94] ss:$8 sps:$4 sm:$0xff]  }
 0x33d   :  { %1000 = vmatprep.subr.bf16.mxu1 %v1559_v36 }
 0x33e   :  { %659 = vadd.xlane.f32.xlu0 %v657_v51  ;;  %v658_v53 = vmul.f32 %v1342_v48, %v649_v52  ;;  %1001 = vmatpush1.bf16.msra.mxu1 %v1557_v37  ;;  %v1577_v48 = vld [vmem:[#allocation14 + $0x84] ss:$8 sps:$4 sm:$0xff]   ;;  %v1578_v51 = vld [vmem:[#allocation14 + $0x90] ss:$8 sps:$4 sm:$0xff]  }
 0x33f   :  { %1002 = vmatprep.subr.bf16.mxu1 %v1562_v38  ;;  %v1583_v52 = vld [vmem:[#allocation14 + $0xa4] ss:$8 sps:$4 sm:$0xff]  }
 0x340   :  { %661 = vadd.xlane.f32.xlu1 %v658_v53  ;;  %v1581_v53 = vld [vmem:[#allocation14 + $0xa0] ss:$8 sps:$4 sm:$0xff]  }
 0x342   :  { %1003 = vmatpush1.bf16.msra.mxu1 %v1560_v39 }
 0x343   :  { %1004 = vmatprep.subr.bf16.mxu1 %v1565_v40 }
 0x346   :  { %1005 = vmatpush1.bf16.msra.mxu1 %v1563_v41 }
 0x347   :  { %1006 = vmatprep.subr.bf16.mxu1 %v1568_v42 }
 0x34a   :  { %1007 = vmatpush1.bf16.msra.mxu1 %v1566_v43 }
 0x34b   :  { %1008 = vmatprep.subr.bf16.mxu1 %v1571_v44 }
 0x34e   :  { %1009 = vmatpush1.bf16.msra.mxu1 %v1569_v45  ;;  %v789_v45 = vld [vmem:[#allocation8] sm:$0x3] }
 0x34f   :  { %1010 = vmatprep.subr.bf16.mxu1 %v1574_v46 }
 0x351   :  { %670 = vperm.xlu1 %1524, %v1343_v54   ;;  %v1586_v54 = vld [vmem:[#allocation14 + $0xb4] ss:$8 sps:$4 sm:$0xff]  }
 0x352   :  { %1011 = vmatpush1.bf16.msra.mxu1 %v1572_v47 }
 0x353   :  { %1012 = vmatprep.subr.bf16.mxu1 %v1577_v48 }
 0x356   :  { %1013 = vmatpush1.bf16.msra.mxu1 %v1575_v49 }
 0x357   :  { %1014 = vmatprep.subr.bf16.mxu1 %v1580_v50 }
 0x35a   :  { %1015 = vmatpush1.bf16.msra.mxu1 %v1578_v51 }
 0x35b   :  { %1016 = vmatprep.subr.bf16.mxu1 %v1583_v52  ;;  %v1593_v52 = vld [vmem:[#allocation15 + $0x40] sm:$0xff]  }
 0x35c   :  { %1427 = vmatprep.subr.bf16.mxu0 %v1593_v52 }
 0x35e   :  { %1017 = vmatpush1.bf16.msra.mxu1 %v1581_v53  ;;  %v1594_v53 = vld [vmem:[#allocation15] sm:$0xff]  }
 0x35f   :  { %1018 = vmatprep.subr.bf16.mxu1 %v1586_v54  ;;  %1428 = vmatpush3.bf16.msra.mxu0 %v1594_v53  ;;  %v1595_v54 = vld [vmem:[#allocation15 + $0x48] sm:$0xff]  }
 0x360   :  { %1429 = vmatprep.subr.bf16.mxu0 %v1595_v54  ;;  %v1398_v54 = vld [vmem:[#allocation3] ss:$0 sm:$0xff] }
 0x3cb   :  { %v660_v56 = vpop.xlane.xlu0 %659 }
 0x3cd   :  { %v662_v55 = vpop.xlane.xlu1 %661 }
 0x3d1   :  { %v671_v57 = vpop.permute.xlu1 %670 }
 0x3d2   :  { %v673_v58 = vadd.f32 %v671_v57, %v660_v56  ;;  %v674_v59 = vadd.f32 %v671_v57, %v662_v55  ;;  %v1584_v55 = vld [vmem:[#allocation14 + $0xb0] ss:$8 sps:$4 sm:$0xff]  }
 0x3d3   :  { %1019 = vmatpush1.bf16.msra.mxu1 %v1584_v55  ;;  %v1596_v55 = vld [vmem:[#allocation15 + $0x8] sm:$0xff]  }
 0x3d4   :  { %v1344_v60 = vmul.f32 -1.442695, %v673_v58  ;;  %v1345_v61 = vmul.f32 -1.442695, %v674_v59  ;;  %1430 = vmatpush3.bf16.msra.mxu0 %v1596_v55 }
 0x3d6   :  { %1625 = vpow2.f32 %v1344_v60 }
 0x3d7   :  { %1627 = vpow2.f32 %v1345_v61 }
 0x3e0   :  { %v1626_v62 = vpop.eup %1625 }
 0x3e1   :  { %v1628_v63 = vpop.eup %1627  ;;  %v681_v0 = vadd.f32 1.0, %v1626_v62 }
 0x3e2   :  { %v682_v1 = vadd.f32 1.0, %v1628_v63 }
 0x3e3   :  { %1629 = vrcp.f32 %v681_v0 }
 0x3e4   :  { %1631 = vrcp.f32 %v682_v1 }
 0x3ed   :  { %v1630_v7 = vpop.eup %1629 }
 0x3ee   :  { %v1632_v9 = vpop.eup %1631  ;;  %v696_v11 = vrot.slane %v1630_v7, %v695_v4 }
 0x3ef   :  { %v700_v13 = vrot.slane %v1632_v9, %v695_v4 }
 0x3f1   :  { %v702_v14 = vsel %vm701_vm2, %v700_v13, %v696_v11 }
 0x3f2   :  { %v704_v8 = vsel %vm688_vm3, %v702_v14, -2.1474836e+09 }
 0x3f3   :  { %v706_v16 = vsel %vm705_vm4, %v704_v8, -inf }
 0x3f4   :  { %707 = vmax.xlane.f32.xlu1 %v706_v16 }
 0x405   :  { %753 = vbcast.lane.b32.xlu1 %v751_v24, 256 }
 0x481   :  { %v708_v17 = vpop.xlane.xlu1 %707 }
 0x482   :  { %v709_v18 = vsub.f32 %v704_v8, %v708_v17 }
 0x484   :  { %v710_v20 = vmul.f32 1.442695, %v709_v18 }
 0x485   :  { %v754_v57 = vpop.permute.xlu1 %753 }
 0x486   :  { %1633 = vpow2.f32 %v710_v20  ;;  %v762_v59 = vmul.f32 %v2126_v15, %v754_v57  ;;  %v1587_v20 = vld [vmem:[#allocation14 + $0xc0] ss:$8 sps:$4 sm:$0xff]   ;;  %v1598_v57 = vld [vmem:[#allocation15 + $0x10] sm:$0xff]  }
 0x488   :  { %v764_v63 = vsel %vm240_vm1, %v762_v59, 0.0  ;;  %v1600_v59 = vld [vmem:[#allocation15 + $0x18] sm:$0xff]  }
 0x490   :  { %v1634_v2 = vpop.eup %1633 }
 0x491   :  { %v712_v21 = vsel %vm705_vm4, %v1634_v2, 0.0 }
 0x492   :  { %713 = vadd.xlane.f32.xlu0 %v712_v21 }
 0x4a8   :  { %760 = vbcast.lane.b32.xlu0 %v758_v23, 256 }
 0x51f   :  { %v714_v25 = vpop.xlane.xlu0 %713 }
 0x520   :  { %1635 = vrcp.f32 %v714_v25 }
 0x521   :  { %1637 = vrcp.f32 %v778_v26 }
 0x523   :  { %v761_v56 = vpop.permute.xlu0 %760 }
 0x524   :  { %v763_v58 = vmul.f32 %v2133_v19, %v761_v56  ;;  %v1597_v56 = vld [vmem:[#allocation15 + $0x50] sm:$0xff]  }
 0x525   :  { %1431 = vmatprep.subr.bf16.mxu0 %v1597_v56 }
 0x526   :  { %v771_v60 = vsel %vm240_vm1, %v763_v58, 0.0  ;;  %1432 = vmatpush3.bf16.msra.mxu0 %v1598_v57  ;;  %v1599_v58 = vld [vmem:[#allocation15 + $0x58] sm:$0xff]  }
 0x527   :  { %v772_v0 = vrot.slane %v771_v60, 4  ;;  %1433 = vmatprep.subr.bf16.mxu0 %v1599_v58 }
 0x529   :  { %v773_v9 = vadd.f32 %v772_v0, %v771_v60  ;;  %v1601_v60 = vld [vmem:[#allocation15 + $0x60] sm:$0xff]   ;;  %v1605_v0 = vld [vmem:[#allocation15 + $0x70] sm:$0xff]  }
 0x52a   :  { %v1636_v27 = vpop.eup %1635  ;;  %1434 = vmatpush3.bf16.msra.mxu0 %v1600_v59 }
 0x52b   :  { %v716_v28 = vmul.f32 %v1636_v27, %v1634_v2  ;;  %v1638_v31 = vpop.eup %1637  ;;  %v774_v17 = vrot.slane %v773_v9, 2  ;;  %v1589_v2 = vld [vmem:[#allocation14 + $0xc4] ss:$8 sps:$4 sm:$0xff]   ;;  %v1590_v27 = vld [vmem:[#allocation14 + $0xd0] ss:$8 sps:$4 sm:$0xff]   ;;  %1435 = vmatprep.subr.bf16.mxu0 %v1601_v60 }
 0x52c   :  { %1020 = vmatprep.subr.bf16.mxu1 %v1589_v2 }
 0x52d   :  { %v717_v29 = vmul.f32 %v716_v28, %v687_v5  ;;  %v765_v5 = vrot.slane %v764_v63, 4  ;;  %1021 = vmatpush1.bf16.msra.mxu1 %v1587_v20  ;;  %v775_v24 = vadd.f32 %v774_v17, %v773_v9 }
 0x52f   :  { %v721_v30 = vrot.slane %v717_v29, %v2124_v12  ;;  %v728_v6 = vrot.slane %v717_v29, %v2203_v22  ;;  %v766_v16 = vadd.f32 %v765_v5, %v764_v63  ;;  %v1604_v63 = vld [vmem:[#allocation15 + $0x28] sm:$0xff]   ;;  %v841_v5 = vld [vmem:[%s2270_s17] sm:$0x3] }
 0x530   :  { %v846_v9 = vrot.slane %v841_v5, %v2124_v12 }
 0x531   :  { %723 = vbcast.lane.b32.xlu0 %v721_v30, 256  ;;  %v767_v23 = vrot.slane %v766_v16, 2  ;;  %v776_v30 = vrot.slane %v775_v24, 1 }
 0x533   :  { %v768_v29 = vadd.f32 %v767_v23, %v766_v16  ;;  %v777_v36 = vadd.f32 %v776_v30, %v775_v24 }
 0x535   :  { %730 = vbcast.lane.b32.xlu0 %v728_v6, 256  ;;  %v769_v32 = vrot.slane %v768_v29, 1 }
 0x537   :  { %v770_v38 = vadd.f32 %v769_v32, %v768_v29 }
 0x539   :  { %782 = vperm.xlu0 %1525, %v1638_v31  }
 0x5a3   :  { %v724_v61 = vpop.permute.xlu0 %723 }
 0x5a4   :  { %v732_v62 = vmul.f32 %v2126_v15, %v724_v61  ;;  %v1602_v61 = vld [vmem:[#allocation15 + $0x20] sm:$0xff]  }
 0x5a5   :  { %1436 = vmatpush3.bf16.msra.mxu0 %v1602_v61 }
 0x5a6   :  { %v734_v1 = vsel %vm240_vm1, %v732_v62, 0.0  ;;  %v1603_v62 = vld [vmem:[#allocation15 + $0x68] sm:$0xff]  }
 0x5a7   :  { %v735_v3 = vrot.slane %v734_v1, 4  ;;  %v731_v4 = vpop.permute.xlu0 %730  ;;  %1437 = vmatprep.subr.bf16.mxu0 %v1603_v62 }
 0x5a8   :  { %v733_v7 = vmul.f32 %v2133_v19, %v731_v4  ;;  %v1592_v19 = vld [vmem:[#allocation14 + $0xd4] ss:$8 sps:$4 sm:$0xff]  }
 0x5a9   :  { %v736_v11 = vadd.f32 %v735_v3, %v734_v1  ;;  %1022 = vmatprep.subr.bf16.mxu1 %v1592_v19  ;;  %1438 = vmatpush3.bf16.msra.mxu0 %v1604_v63  ;;  %v1606_v1 = vld [vmem:[#allocation15 + $0x30] sm:$0xff]   ;;  %v1607_v3 = vld [vmem:[#allocation15 + $0x78] sm:$0xff]  }
 0x5aa   :  { %v741_v13 = vsel %vm240_vm1, %v733_v7, 0.0  ;;  %1023 = vmatpush1.bf16.msra.mxu1 %v1590_v27  ;;  %1439 = vmatprep.subr.bf16.mxu0 %v1605_v0  ;;  %v1608_v4 = vld [vmem:[#allocation15 + $0x38] sm:$0xff]   ;;  %v1037_v7 = vld [vmem:[%s2271_s18] sm:$0x3] }
 0x5ab   :  { %v737_v14 = vrot.slane %v736_v11, 2  ;;  %v742_v8 = vrot.slane %v741_v13, 4  ;;  %v1046_v16 = vrot.slane %v1037_v7, %v2203_v22 }
 0x5ad   :  { %v738_v18 = vadd.f32 %v737_v14, %v736_v11  ;;  %v743_v15 = vadd.f32 %v742_v8, %v741_v13  ;;  %1440 = vmatpush3.bf16.msra.mxu0 %v1606_v1  ;;  %v1051_v11 = vld [vmem:[%s2272_s19] sm:$0x3]  ;;  %v850_v13 = vrot.slane %v841_v5, %v2203_v22  ;;  %v1042_v14 = vrot.slane %v1037_v7, %v2124_v12 }
 0x5ae   :  { %1441 = vmatprep.subr.bf16.mxu0 %v1607_v3  ;;  %v1060_v2 = vrot.slane %v1051_v11, %v2203_v22 }
 0x5af   :  { %v744_v21 = vrot.slane %v743_v15, 2  ;;  %v739_v25 = vrot.slane %v738_v18, 1 }
 0x5b1   :  { %v745_v26 = vadd.f32 %v744_v21, %v743_v15  ;;  %v740_v6 = vadd.f32 %v739_v25, %v738_v18  ;;  %1442 = vmatpush3.bf16.msra.mxu0 %v1608_v4  ;;  %v1056_v18 = vrot.slane %v1051_v11, %v2124_v12 }
 0x5b3   :  { %v746_v28 = vrot.slane %v745_v26, 1 }
 0x5b5   :  { %v747_v31 = vadd.f32 %v746_v28, %v745_v26 }
 0x5b7   :  { %v802_v33 = vsel %vm701_vm2, %v747_v31, %v740_v6 }
 0x5b8   :  { %v783_v34 = vpop.permute.xlu0 %782  ;;  %v1526_v35 = vpack.i.bf16 %v802_v33, %v2119_v10 }
 0x5b9   :  { %v784_v37 = vrot.slane %v783_v34, 1  ;;  %v787_v40 = vmul.f32 %v783_v34, %v770_v38 }
 0x5ba   :  { %1527 = vrot.lane.b32.xlu1 %v1526_v35, %s1853_s5 }
 0x5bb   :  { %v788_v39 = vmul.f32 %v784_v37, %v777_v36  ;;  %v1377_v37 = vld [vmem:[%s2274_s21] ss:$0 sm:$0xff] }
 0x5bd   :  { %v795_v41 = vrot.slane %v788_v39, 7 }
 0x5bf   :  { %v796_v42 = vsel %vm701_vm2, %v795_v41, %v787_v40  ;;  %v1394_v41 = vld [vmem:[%s2275_s22] ss:$0 sm:$0xff] }
 0x5c0   :  { %797 = vrot.lane.b32.xlu0 %v796_v42, %s1854_s27 }
 0x62c   :  { %v1528_v43 = vpop.permute.xlu1 %1527 }
 0x62d   :  { %v1529_v44 = vunpack.i.l.bf16 %v1528_v43  ;;  %v1530_v46 = vunpack.i.h.bf16 %v1528_v43 }
 0x62f   :  { %v807_v10 = vsel %vm806_vm5, %v789_v45, %v1529_v44  ;;  %v1395_v44 = vld [vmem:[%s2276_s23] ss:$0 sm:$0xff] }
 0x632   :  { %v798_v47 = vpop.permute.xlu0 %797 }
 0x633   :  { %v809_v48 = vsel %vm808_vm6, %v807_v10, %v798_v47  ;;  %v810_v49 = vsel %vm806_vm5, %v798_v47, %v1530_v46 }
 0x634   :  { %v811_v50 = vpack.c.bf16 %v809_v48, %v809_v48  ;;  %v812_v51 = vpack.c.bf16 %v810_v49, %v810_v49 }
 0x636   :  { %1374 = vmatprep.mubr.msk.bf16.mxu1 %vm808_vm6, %v812_v51 }
 0x637   :  { %1029 = vmatmul.mubr.bf16.vlgmr.msra.gmra.mrb[4].mxu1 %v811_v50  ;;  %v1397_v50 = vld [vmem:[%s2277_s24] ss:$0 sm:$0xff] }
 0x70a   :  { %v1030_v8 = vpop.f32.mrb[4].mxu1 }
 0x70b   :  { %v1031_v17 = vadd.f32 %v1030_v8, %v846_v9  ;;  %v1032_v15 = vpop.f32.mrb[5].mxu1 }
 0x70c   :  { %v1033_v20 = vadd.f32 %v1032_v15, %v850_v13  ;;  %v1034_v21 = vpop.f32.mrb[6].mxu1 }
 0x70d   :  { %v1049_v23 = vmul.f32 %v1042_v14, %v1031_v17  ;;  %v1035_v24 = vpop.f32.mrb[7].mxu1 }
 0x70e   :  { %v1050_v25 = vmul.f32 %v1046_v16, %v1033_v20 }
 0x70f   :  { %v1063_v26 = vadd.f32 %v1056_v18, %v1049_v23 }
 0x710   :  { %v1064_v19 = vadd.f32 %v1060_v2, %v1050_v25 }
 0x711   :  { %v1375_v27 = vmul.f32 -1.442695, %v1063_v26 }
 0x712   :  { %v1376_v28 = vmul.f32 -1.442695, %v1064_v19 }
 0x713   :  { %1639 = vpow2.f32 %v1375_v27 }
 0x714   :  { %1641 = vpow2.f32 %v1376_v28 }
 0x71d   :  { %v1640_v29 = vpop.eup %1639 }
 0x71e   :  { %v1642_v30 = vpop.eup %1641  ;;  %v1071_v6 = vadd.f32 1.0, %v1640_v29 }
 0x71f   :  { %v1072_v31 = vadd.f32 1.0, %v1642_v30 }
 0x720   :  { %1643 = vrcp.f32 %v1071_v6 }
 0x721   :  { %1645 = vrcp.f32 %v1072_v31 }
 0x72a   :  { %v1644_v12 = vpop.eup %1643 }
 0x72b   :  { %v1646_v32 = vpop.eup %1645  ;;  %v1077_v33 = vmul.f32 %v1644_v12, %v1031_v17 }
 0x72c   :  { %v1078_v22 = vmul.f32 %v1646_v32, %v1033_v20 }
 0x72d   :  { %v1079_v35 = vpack.c.bf16 %v1077_v33, %v1077_v33 }
 0x72e   :  { %v1080_v34 = vpack.c.bf16 %v1078_v22, %v1078_v22 }
 0x730   :  { %1248 = vmatprep.mubr.bf16.mxu0 %v1080_v34 }
 0x731   :  { %1249 = vmatmul.mubr.bf16.vlgmr.msra.gmra.mrb[8].mxu0 %v1079_v35 }
 0x804   :  { %v1443_v36 = vpop.f32.mrb[8].mxu0 }
 0x805   :  { %v1444_v38 = vpop.f32.mrb[9].mxu0 }
 0x806   :  { %v1445_v39 = vadd.f32 %v1444_v38, %v1443_v36  ;;  %v1446_v40 = vpop.f32.mrb[10].mxu0 }
 0x807   :  { %v1447_v42 = vpop.f32.mrb[11].mxu0 }
 0x808   :  { %v1251_v43 = vadd.f32 %v1445_v39, %v1377_v37 }
 0x80a   :  { %v1263_v45 = vmul.f32 %v1394_v41, %v1251_v43 }
 0x80c   :  { %v1271_v46 = vadd.f32 %v1395_v44, %v1263_v45 }
 0x80e   :  { %v1396_v47 = vmul.f32 -1.442695, %v1271_v46 }
 0x810   :  { %1647 = vpow2.f32 %v1396_v47 }
 0x81a   :  { %v1648_v10 = vpop.eup %1647 }
 0x81b   :  { %v1275_v48 = vadd.f32 1.0, %v1648_v10 }
 0x81d   :  { %1649 = vrcp.f32 %v1275_v48 }
 0x827   :  { %v1650_v49 = vpop.eup %1649 }
 0x828   :  { %v1278_v51 = vmul.f32 %v1650_v49, %v1251_v43 }
 0x82a   :  { %v1286_v52 = vmul.f32 %v1397_v50, %v1278_v51 }
 0x82c   :  { %v1288_v53 = vsel %vm1287_vm7, %v1286_v52, 0.0 }
 0x82d   :  { %1289 = vadd.xlane.f32.xlu1 %v1288_v53 }
 0x8ba   :  { %v1290_v55 = vpop.xlane.xlu1 %1289 }
 0x8bb   :  { %v1298_v56 = vadd.f32 %v1398_v54, %v1290_v55 }
 0x8bd   :  { %1300 = vst.msk [vmem:[%s2310_s2] sm:$0x3] %vm1299_vm8, %v1298_v56 }
 0x8be   :  { %1305 = vsyncpa [#allocation5], 1 }
 0x8bf   :  { %1306 = vsyncpa [#allocation7], 1 }
 0x8c0   :  { %1307 = vsyncpa [#allocation10], 1 }
 0x8c1   :  { %1308 = vsyncpa [#allocation13], 1 }
 0x8c2   :  { %1309 = vsyncpa [#allocation16], 1 }

</bundles_post_ra>
